<compile_context>
chip_gen: v5e
topology: v5e:2x2
jax: 0.10.0
libtpu: 0.0.40
codegen_flags: <defaults>
</compile_context>

<pallas_src>
import functools

import jax
import jax.numpy as jnp
from jax.experimental import pallas as pl
from jax.experimental.pallas import tpu as pltpu

LN_EPS = 1e-5   # PyTorch nn.LayerNorm default
LANE = 128
SUBLANE = 8


def _round_up(x, m):
    return (x + m - 1) // m * m


def _pad_to(x, shape):
    return jnp.pad(x, [(0, t - s) for s, t in zip(x.shape, shape)])


def _largest_divisor(n, candidates):
    for c in candidates:
        if c <= n and n % c == 0:
            return c
    return n


def _vmem_limit_bytes():
    # Per-generation scoped-VMEM budget: leave ~16 MiB headroom, cap at 96 MiB.
    # v5e/v6e (128 MiB physical) -> 96 MiB; v7x (64 MiB per TC) -> 48 MiB.
    try:
        cap = int(pltpu.get_tpu_info().vmem_capacity_bytes)
    except Exception:
        cap = 128 * 1024 * 1024
    return int(min(max(cap - 16 * 1024 * 1024, 32 * 1024 * 1024), 96 * 1024 * 1024))


# ----------------------------- in-kernel helpers -----------------------------

def _layernorm(x, g, b, d_true, lane_mask):
    """LayerNorm over the last dim; x/g/b may be zero-padded past d_true.  Two-pass
    variance with the padded lanes masked out of the sums (real feature count d_true)."""
    inv_d = 1.0 / d_true
    mu = jnp.sum(x, axis=-1, keepdims=True) * inv_d
    d = jnp.where(lane_mask, x - mu, 0.0)
    var = jnp.sum(d * d, axis=-1, keepdims=True) * inv_d
    return d * jax.lax.rsqrt(var + LN_EPS) * g + b


def _erf(x):
    # Abramowitz & Stegun 7.1.26 rational approximation (|err| <= 1.5e-7).
    a1, a2, a3, a4, a5 = 0.254829592, -0.284496736, 1.421413741, -1.453152027, 1.061405429
    p = 0.3275911
    s = jnp.where(x >= 0.0, 1.0, -1.0)
    ax = jnp.abs(x)
    t = 1.0 / (1.0 + p * ax)                 # exact divide (correctness feedback)
    poly = ((((a5 * t + a4) * t + a3) * t + a2) * t + a1) * t
    return s * (1.0 - poly * jnp.exp(-ax * ax))


def _gelu_exact(x):
    return 0.5 * x * (1.0 + _erf(x * 0.7071067811865476))


# ----------------------------- layer-stack kernel ----------------------------

def transformer_layer_kernel(n_heads, d_head, d_model,
                             resid_in, vec4, wqkv, bqkv, wo2d, w1, b1, w2,
                             resid_out):
    """One (batch_block, layer) grid step: pre-LN causal MHA + MLP on the VMEM-resident
    residual (carried in the output block across the layer axis)."""
    l = pl.program_id(1)
    H, dh = n_heads, d_head

    @pl.when(l == 0)
    def _():
        resid_out[...] = resid_in[...]

    x3 = resid_out[...]                       # (Bblk, Sp, Dp) f32, padded lanes == 0
    Bb, Sp, Dp = x3.shape
    R = Bb * Sp
    G = H * Bb
    x = x3.reshape(R, Dp)

    lane = jax.lax.broadcasted_iota(jnp.int32, (1, Dp), 1)
    lmask = lane < d_model

    vp = vec4[0]                              # (4, Dp): [ln1_g, ln1_b, b_O, b_mlp2]
    xn = _layernorm(x, vp[0:1], vp[1:2], d_model, lmask)

    # ---------------- attention path (pre-LN, causal) ----------------
    # Fused QKV: one lane-dense 2-D matmul (bf16 operands, f32 accumulate).
    qkv = jnp.dot(xn.astype(jnp.bfloat16), wqkv[0],
                  preferred_element_type=jnp.float32) + bqkv[0]          # (R, 3*H*dh)
    # (R, 3H*dh) -> (3H, R, dh) -> (3H*Bb, Sp, dh)   [group index g = head*Bb + batch_row]
    qkv = qkv.reshape(R, 3 * H, dh)
    qkv = pltpu.einshape("rjd->jrd", qkv)
    qkv = qkv.reshape(3 * G, Sp, dh)
    q = qkv[:G].astype(jnp.bfloat16)
    k = qkv[G:2 * G].astype(jnp.bfloat16)
    v = qkv[2 * G:].astype(jnp.bfloat16)

    scale = 1.0 / (dh ** 0.5)
    s = jnp.einsum("gqe,gke->gqk", q, k,
                   preferred_element_type=jnp.float32) * scale           # (G, Sp, Sp) f32
    row = jax.lax.broadcasted_iota(jnp.int32, (Sp, Sp), 0)
    col = jax.lax.broadcasted_iota(jnp.int32, (Sp, Sp), 1)
    s = jnp.where((col <= row)[None], s, -1e9)       # mask applied while scores are f32
    s = s - jnp.max(s, axis=-1, keepdims=True)
    e = jnp.exp(s)
    patt = e * pl.reciprocal(jnp.sum(e, axis=-1, keepdims=True), approx=True)

    z = jnp.einsum("gqk,gke->gqe", patt.astype(jnp.bfloat16), v,
                   preferred_element_type=jnp.float32)                   # (G, Sp, dh)
    # (H*Bb, Sp, dh) -> (H, R, dh) -> (R, H, dh) -> (R, H*dh): flattened output projection.
    z = z.reshape(H, R, dh)
    z = pltpu.einshape("hrd->rhd", z)
    z2 = z.reshape(R, H * dh).astype(jnp.bfloat16)
    attn_out = jnp.dot(z2, wo2d[0], preferred_element_type=jnp.float32) + vp[2:3]

    resid_mid = x + attn_out

    # ---------------- MLP path (reference forward does NOT apply ln2) ----------------
    h1 = jnp.dot(resid_mid.astype(jnp.bfloat16), w1[0],
                 preferred_element_type=jnp.float32) + b1[0]
    h1 = _gelu_exact(h1)
    mlp_out = jnp.dot(h1.astype(jnp.bfloat16), w2[0],
                      preferred_element_type=jnp.float32) + vp[3:4]

    resid_out[...] = (resid_mid + mlp_out).reshape(Bb, Sp, Dp)


# ----------------------------- ln_final + unembed kernel ----------------------

def unembed_kernel(d_model, resid_ref, lnf_ref, wu_ref, bu_ref, out_ref, xn_scr):
    """Grid (row_tile, vocab_tile); ln_final computed once per row tile (vocab tile 0) and
    cached in VMEM, then one (rows x Dp) @ (Dp x Vtile) matmul per vocab tile."""
    v = pl.program_id(1)

    @pl.when(v == 0)
    def _():
        x = resid_ref[...]                    # (Rt, Dp) f32
        lane = jax.lax.broadcasted_iota(jnp.int32, (1, x.shape[-1]), 1)
        xn = _layernorm(x, lnf_ref[0:1], lnf_ref[1:2], d_model, lane < d_model)
        xn_scr[...] = xn.astype(jnp.bfloat16)

    out_ref[...] = jnp.dot(xn_scr[...], wu_ref[...],
                           preferred_element_type=jnp.float32) + bu_ref[...]


# ----------------------------- wrapper ---------------------------------------

def _build_layer_weights(params, cfg, Dp, Mp):
    """Stack per-layer weights on a leading L axis, pack small vectors, zero-pad feature
    dims to lane multiples, and cast matmul operands to bf16 (biases / LN params f32)."""
    L, H, dh = cfg["n_layers"], cfg["n_heads"], cfg["d_head"]
    D = cfg["d_model"]
    HD = H * dh
    st = lambda key: jnp.stack([blk[key] for blk in params["blocks"]], axis=0)

    # packed per-layer vectors: rows = [ln1_g, ln1_b, b_O, b_mlp2]
    vec4 = jnp.stack([st("ln1_g"), st("ln1_b"), st("bo"), st("b2")], axis=1)   # (L, 4, D)
    vec4 = _pad_to(vec4, (L, 4, Dp))

    def head_flat(w):                         # (L, H, D, dh) -> (L, D, H*dh) head-major cols
        return jnp.transpose(w, (0, 2, 1, 3)).reshape(L, D, HD)

    wqkv = jnp.concatenate(
        [head_flat(st("wq")), head_flat(st("wk")), head_flat(st("wv"))], axis=2)
    wqkv = _pad_to(wqkv, (L, Dp, 3 * HD)).astype(jnp.bfloat16)                 # (L, Dp, 3HD)
    bqkv = jnp.concatenate([st("bq"), st("bk"), st("bv")], axis=1).reshape(L, 1, 3 * HD)

    wo2d = _pad_to(st("wo").reshape(L, HD, D), (L, HD, Dp)).astype(jnp.bfloat16)
    w1 = _pad_to(st("w1"), (L, Dp, Mp)).astype(jnp.bfloat16)
    b1 = _pad_to(st("b1")[:, None, :], (L, 1, Mp))
    w2 = _pad_to(st("w2"), (L, Mp, Dp)).astype(jnp.bfloat16)
    return [vec4, wqkv, bqkv, wo2d, w1, b1, w2]


def transformer_forward(tokens, params, cfg):
    B, S = tokens.shape
    D, M, V = cfg["d_model"], cfg["d_mlp"], cfg["d_vocab"]
    H, dh, L = cfg["n_heads"], cfg["d_head"], cfg["n_layers"]
    HD = H * dh
    Dp, Mp, Vp = _round_up(D, LANE), _round_up(M, LANE), _round_up(V, LANE)
    Sp = _round_up(S, SUBLANE)

    # Embedding gather + positional embedding (data-dependent gather kept in plain JAX).
    resid0 = params["W_E"][tokens] + params["W_pos"][None, :S, :]
    resid0 = _pad_to(resid0, (B, Sp, Dp))

    weights = _build_layer_weights(params, cfg, Dp, Mp)
    vmem_limit = _vmem_limit_bytes()

    # Fold batch rows per grid step (amortize per-layer weight DMA, fill MXU M dim),
    # keeping >= 2 batch blocks for megacore when B allows.
    Bblk = 1
    for c in range(1, B + 1):
        if B % c == 0 and c * Sp <= 256 and (B // c >= 2 or B < 4):
            Bblk = c
    Bgrid = B // Bblk

    kernel = functools.partial(transformer_layer_kernel, H, dh, D)

    layer_specs = [
        pl.BlockSpec((1, 4, Dp), lambda b, l: (l, 0, 0)),        # vec4
        pl.BlockSpec((1, Dp, 3 * HD), lambda b, l: (l, 0, 0)),   # wqkv
        pl.BlockSpec((1, 1, 3 * HD), lambda b, l: (l, 0, 0)),    # bqkv
        pl.BlockSpec((1, HD, Dp), lambda b, l: (l, 0, 0)),       # wo2d
        pl.BlockSpec((1, Dp, Mp), lambda b, l: (l, 0, 0)),       # w1
        pl.BlockSpec((1, 1, Mp), lambda b, l: (l, 0, 0)),        # b1
        pl.BlockSpec((1, Mp, Dp), lambda b, l: (l, 0, 0)),       # w2
    ]

    resid_final = pl.pallas_call(
        kernel,
        out_shape=jax.ShapeDtypeStruct((B, Sp, Dp), jnp.float32),
        grid_spec=pltpu.PrefetchScalarGridSpec(
            num_scalar_prefetch=0,
            grid=(Bgrid, L),
            in_specs=[pl.BlockSpec((Bblk, Sp, Dp), lambda b, l: (b, 0, 0))] + layer_specs,
            out_specs=pl.BlockSpec((Bblk, Sp, Dp), lambda b, l: (b, 0, 0)),
            scratch_shapes=[]),
        compiler_params=pltpu.CompilerParams(
            dimension_semantics=("parallel", "arbitrary"),
            vmem_limit_bytes=vmem_limit),
    )(resid0, *weights)

    # ---------------- final LayerNorm + unembed: separate vocab-tiled kernel ----------------
    Rp = B * Sp
    Rt = Rp if Rp <= 256 else _largest_divisor(Rp, [256, 128, 64, 32, 16, 8])
    Vt = _largest_divisor(Vp, [2048, 1024, 512, 256, 128])

    lnf = _pad_to(jnp.stack([params["lnf_g"], params["lnf_b"]], axis=0), (2, Dp))
    wu = _pad_to(params["W_U"], (Dp, Vp)).astype(jnp.bfloat16)
    bu = _pad_to(params["b_U"][None, :], (1, Vp))

    ukernel = functools.partial(unembed_kernel, D)
    logits_flat = pl.pallas_call(
        ukernel,
        out_shape=jax.ShapeDtypeStruct((Rp, Vp), jnp.float32),
        grid_spec=pltpu.PrefetchScalarGridSpec(
            num_scalar_prefetch=0,
            grid=(Rp // Rt, Vp // Vt),
            in_specs=[
                pl.BlockSpec((Rt, Dp), lambda r, v: (r, 0)),     # residual rows
                pl.BlockSpec((2, Dp), lambda r, v: (0, 0)),      # lnf gamma/beta
                pl.BlockSpec((Dp, Vt), lambda r, v: (0, v)),     # W_U vocab tile
                pl.BlockSpec((1, Vt), lambda r, v: (0, v)),      # b_U vocab tile
            ],
            out_specs=pl.BlockSpec((Rt, Vt), lambda r, v: (r, v)),
            scratch_shapes=[pltpu.VMEM((Rt, Dp), jnp.bfloat16)]),
        compiler_params=pltpu.CompilerParams(
            dimension_semantics=("parallel", "arbitrary"),
            vmem_limit_bytes=vmem_limit),
    )(resid_final.reshape(Rp, Dp), lnf, wu, bu)

    return logits_flat.reshape(B, Sp, Vp)[:, :S, :V]


# ----------------------------- params & pure-JAX reference ---------------------

def init_params(key, cfg):
    D, V, H, dh = cfg["d_model"], cfg["d_vocab"], cfg["n_heads"], cfg["d_head"]
    M, n_ctx, L = cfg["d_mlp"], cfg["n_ctx"], cfg["n_layers"]
    std = cfg["init_range"]

    def nrm(k, shape):
        return std * jax.random.normal(k, shape, jnp.float32)

    keys = jax.random.split(key, 3 + 8 * L)
    params = {
        "W_E": nrm(keys[0], (V, D)),
        "W_pos": nrm(keys[1], (n_ctx, D)),
        "W_U": nrm(keys[2], (D, V)),
        "b_U": jnp.zeros((V,), jnp.float32),
        "lnf_g": jnp.ones((D,), jnp.float32),
        "lnf_b": jnp.zeros((D,), jnp.float32),
        "blocks": [],
    }
    ki = 3
    for _ in range(L):
        k = keys[ki:ki + 8]
        ki += 8
        layer = {
            "ln1_g": jnp.ones((D,), jnp.float32),
            "ln1_b": jnp.zeros((D,), jnp.float32),
            # W_Q/W_K/W_V: (H, D, dh); W_O: (H, dh, D); biases (H, dh) / (D,)
            "wq": nrm(k[0], (H, D, dh)), "bq": jnp.zeros((H, dh), jnp.float32),
            "wk": nrm(k[1], (H, D, dh)), "bk": jnp.zeros((H, dh), jnp.float32),
            "wv": nrm(k[2], (H, D, dh)), "bv": jnp.zeros((H, dh), jnp.float32),
            "wo": nrm(k[3], (H, dh, D)), "bo": jnp.zeros((D,), jnp.float32),
            # nn.Linear weights stored transposed: y = x @ w + b
            "w1": nrm(k[4], (D, M)), "b1": nrm(k[5], (M,)),
            "w2": nrm(k[6], (M, D)), "b2": jnp.zeros((D,), jnp.float32),
        }
        params["blocks"].append(layer)
    return params


def reference_forward(tokens, params, cfg):
    """Pure-JAX f32 reference (same math, unpadded) for a sanity check."""
    H, dh = cfg["n_heads"], cfg["d_head"]
    B, S = tokens.shape
    x = params["W_E"][tokens] + params["W_pos"][None, :S, :]

    def ln(v, g, b):
        mu = v.mean(-1, keepdims=True)
        var = ((v - mu) ** 2).mean(-1, keepdims=True)
        return (v - mu) / jnp.sqrt(var + LN_EPS) * g + b

    causal = jnp.tril(jnp.ones((S, S), bool))
    for lp in params["blocks"]:
        xn = ln(x, lp["ln1_g"], lp["ln1_b"])
        q = jnp.einsum("bsd,hde->bshe", xn, lp["wq"]) + lp["bq"]
        k = jnp.einsum("bsd,hde->bshe", xn, lp["wk"]) + lp["bk"]
        v = jnp.einsum("bsd,hde->bshe", xn, lp["wv"]) + lp["bv"]
        sc = jnp.einsum("bqhe,bkhe->bhqk", q, k) / (dh ** 0.5)
        sc = jnp.where(causal[None, None], sc, -1e9)
        pat = jax.nn.softmax(sc, axis=-1)
        z = jnp.einsum("bhqk,bkhe->bqhe", pat, v)
        x = x + jnp.einsum("bqhe,hed->bqd", z, lp["wo"]) + lp["bo"]
        h = jax.nn.gelu(x @ lp["w1"] + lp["b1"], approximate=False)
        x = x + h @ lp["w2"] + lp["b2"]
    xn = ln(x, params["lnf_g"], params["lnf_b"])
    return xn @ params["W_U"] + params["b_U"]


# ----------------------------- main --------------------------------------------

if __name__ == "__main__":
    cfg = dict(d_vocab=50, d_model=32, n_ctx=16, d_mlp=64,
               n_heads=4, d_head=8, n_layers=2, init_range=0.02)

    key = jax.random.PRNGKey(0)
    pkey, tkey = jax.random.split(key)
    params = init_params(pkey, cfg)

    batch, seq = 2, 8
    tokens = jax.random.randint(tkey, (batch, seq), 0, cfg["d_vocab"], dtype=jnp.int32)

    logits = transformer_forward(tokens, params, cfg)
    logits = jax.block_until_ready(logits)

    assert logits.shape == (batch, seq, cfg["d_vocab"])
    ref = reference_forward(tokens, params, cfg)
    if not jnp.allclose(logits, ref, atol=1e-2, rtol=1e-2):
        err = float(jnp.max(jnp.abs(logits - ref)))
        raise AssertionError(f"Pallas output does not match JAX reference (max abs err {err})")

    print("KERNEL_OK")
</pallas_src>

<mosaic_0001>
module attributes {stable_mosaic.version = 11 : i64} {
  func.func @transformer_layer_kernel(%arg0: i32, %arg1: i32, %arg2: memref<2x8x128xf32, #tpu.memory_space<vmem>>, %arg3: memref<1x4x128xf32, #tpu.memory_space<vmem>>, %arg4: memref<1x128x96xbf16, #tpu.memory_space<vmem>>, %arg5: memref<1x1x96xf32, #tpu.memory_space<vmem>>, %arg6: memref<1x32x128xbf16, #tpu.memory_space<vmem>>, %arg7: memref<1x128x128xbf16, #tpu.memory_space<vmem>>, %arg8: memref<1x1x128xf32, #tpu.memory_space<vmem>>, %arg9: memref<1x128x128xbf16, #tpu.memory_space<vmem>>, %arg10: memref<2x8x128xf32, #tpu.memory_space<vmem>>) attributes {dimension_semantics = [#tpu.dimension_semantics<parallel>, #tpu.dimension_semantics<arbitrary>], iteration_bounds = array<i64: 1, 2>, scalar_prefetch = 0 : i64, scratch_operands = 0 : i64, tpu.core_type = #tpu.core_type<tc>, window_params = [{transform_indices = @transform_0, window_bounds = array<i64: 2, 8, 128>}, {transform_indices = @transform_1, window_bounds = array<i64: 1, 4, 128>}, {transform_indices = @transform_2, window_bounds = array<i64: 1, 128, 96>}, {transform_indices = @transform_3, window_bounds = array<i64: 1, 1, 96>}, {transform_indices = @transform_4, window_bounds = array<i64: 1, 32, 128>}, {transform_indices = @transform_5, window_bounds = array<i64: 1, 128, 128>}, {transform_indices = @transform_6, window_bounds = array<i64: 1, 1, 128>}, {transform_indices = @transform_7, window_bounds = array<i64: 1, 128, 128>}, {transform_indices = @transform_8, window_bounds = array<i64: 2, 8, 128>}]} {
    %c0_i32 = arith.constant 0 : i32
    %0 = arith.cmpi eq, %arg1, %c0_i32 : i32
    %1 = arith.extui %0 : i1 to i32
    %c0_i32_0 = arith.constant 0 : i32
    %2 = arith.cmpi ne, %1, %c0_i32_0 : i32
    scf.if %2 {
      %c0_58 = arith.constant 0 : index
      %c0_59 = arith.constant 0 : index
      %c0_60 = arith.constant 0 : index
      %146 = vector.load %arg2[%c0_58, %c0_59, %c0_60] : memref<2x8x128xf32, #tpu.memory_space<vmem>>, vector<2x8x128xf32>
      %c0_61 = arith.constant 0 : index
      %c0_62 = arith.constant 0 : index
      %c0_63 = arith.constant 0 : index
      %147 = vector.load %arg10[%c0_61, %c0_62, %c0_63] : memref<2x8x128xf32, #tpu.memory_space<vmem>>, vector<2x8x128xf32>
      tpu.vector_store %arg10[%c0_61, %c0_62, %c0_63], %146 {strides = array<i32>} : memref<2x8x128xf32, #tpu.memory_space<vmem>>, vector<2x8x128xf32>,
    } else {
    }
    %c0 = arith.constant 0 : index
    %c0_1 = arith.constant 0 : index
    %c0_2 = arith.constant 0 : index
    %3 = vector.load %arg10[%c0, %c0_1, %c0_2] : memref<2x8x128xf32, #tpu.memory_space<vmem>>, vector<2x8x128xf32>
    %4 = vector.shape_cast %3 : vector<2x8x128xf32> to vector<16x128xf32>
    %5 = tpu.iota {dimensions = array<i32: 1>} : vector<1x128xi32>
    %c32_i32 = arith.constant 32 : i32
    %6 = vector.broadcast %c32_i32 : i32 to vector<1x128xi32>
    %7 = arith.cmpi slt, %5, %6 : vector<1x128xi32>
    %c0_3 = arith.constant 0 : index
    %c0_4 = arith.constant 0 : index
    %c0_5 = arith.constant 0 : index
    %8 = vector.load %arg3[%c0_3, %c0_4, %c0_5] : memref<1x4x128xf32, #tpu.memory_space<vmem>>, vector<1x4x128xf32>
    %9 = vector.shape_cast %8 : vector<1x4x128xf32> to vector<4x128xf32>
    %10 = vector.extract_strided_slice %9 {offsets = [0, 0], sizes = [1, 128], strides = [1, 1]} : vector<4x128xf32> to vector<1x128xf32>
    %11 = vector.extract_strided_slice %9 {offsets = [1, 0], sizes = [1, 128], strides = [1, 1]} : vector<4x128xf32> to vector<1x128xf32>
    %cst = arith.constant dense<0.000000e+00> : vector<16xf32>
    %12 = vector.multi_reduction <add>, %4, %cst [1] : vector<16x128xf32> to vector<16xf32>
    %13 = vector.shape_cast %12 : vector<16xf32> to vector<16x1xf32>
    %cst_6 = arith.constant 3.125000e-02 : f32
    %14 = vector.broadcast %cst_6 : f32 to vector<16x1xf32>
    %15 = arith.mulf %13, %14 : vector<16x1xf32>
    %16 = vector.broadcast %15 : vector<16x1xf32> to vector<16x128xf32>
    %17 = arith.subf %4, %16 : vector<16x128xf32>
    %cst_7 = arith.constant 0.000000e+00 : f32
    %18 = vector.shape_cast %7 : vector<1x128xi1> to vector<1x128xi1>
    %19 = vector.broadcast %18 : vector<1x128xi1> to vector<16x128xi1>
    %20 = vector.broadcast %cst_7 : f32 to vector<16x128xf32>
    %21 = arith.select %19, %17, %20 : vector<16x128xi1>, vector<16x128xf32>
    %22 = arith.mulf %21, %21 : vector<16x128xf32>
    %cst_8 = arith.constant dense<0.000000e+00> : vector<16xf32>
    %23 = vector.multi_reduction <add>, %22, %cst_8 [1] : vector<16x128xf32> to vector<16xf32>
    %24 = vector.shape_cast %23 : vector<16xf32> to vector<16x1xf32>
    %cst_9 = arith.constant 3.125000e-02 : f32
    %25 = vector.broadcast %cst_9 : f32 to vector<16x1xf32>
    %26 = arith.mulf %24, %25 : vector<16x1xf32>
    %cst_10 = arith.constant 9.99999974E-6 : f32
    %27 = vector.broadcast %cst_10 : f32 to vector<16x1xf32>
    %28 = arith.addf %26, %27 : vector<16x1xf32>
    %29 = math.rsqrt %28 : vector<16x1xf32>
    %30 = vector.broadcast %29 : vector<16x1xf32> to vector<16x128xf32>
    %31 = arith.mulf %21, %30 : vector<16x128xf32>
    %32 = vector.broadcast %10 : vector<1x128xf32> to vector<16x128xf32>
    %33 = arith.mulf %31, %32 : vector<16x128xf32>
    %34 = vector.broadcast %11 : vector<1x128xf32> to vector<16x128xf32>
    %35 = arith.addf %33, %34 : vector<16x128xf32>
    %36 = arith.truncf %35 : vector<16x128xf32> to vector<16x128xbf16>
    %c0_11 = arith.constant 0 : index
    %c0_12 = arith.constant 0 : index
    %c0_13 = arith.constant 0 : index
    %37 = vector.load %arg4[%c0_11, %c0_12, %c0_13] : memref<1x128x96xbf16, #tpu.memory_space<vmem>>, vector<1x128x96xbf16>
    %38 = vector.shape_cast %37 : vector<1x128x96xbf16> to vector<128x96xbf16>
    %cst_14 = arith.constant dense<0.000000e+00> : vector<16x96xf32>
    %39 = tpu.matmul %36, %38, %cst_14 {dimension_numbers = #tpu.dot_dimension_numbers<[1], [0], [0], [1], [0, 0, 1, 1], [], []>} : vector<16x128xbf16>, vector<128x96xbf16>, vector<16x96xf32> -> vector<16x96xf32>
    %c0_15 = arith.constant 0 : index
    %c0_16 = arith.constant 0 : index
    %c0_17 = arith.constant 0 : index
    %40 = vector.load %arg5[%c0_15, %c0_16, %c0_17] : memref<1x1x96xf32, #tpu.memory_space<vmem>>, vector<1x1x96xf32>
    %41 = vector.shape_cast %40 : vector<1x1x96xf32> to vector<1x96xf32>
    %42 = vector.broadcast %41 : vector<1x96xf32> to vector<16x96xf32>
    %43 = arith.addf %39, %42 : vector<16x96xf32>
    %44 = vector.shape_cast %43 : vector<16x96xf32> to vector<16x12x8xf32>
    %45 = tpu.transpose %44, [1, 0, 2] : vector<16x12x8xf32> -> vector<12x16x8xf32>
    %46 = vector.shape_cast %45 : vector<12x16x8xf32> to vector<24x8x8xf32>
    %47 = vector.extract_strided_slice %46 {offsets = [0, 0, 0], sizes = [8, 8, 8], strides = [1, 1, 1]} : vector<24x8x8xf32> to vector<8x8x8xf32>
    %48 = arith.truncf %47 : vector<8x8x8xf32> to vector<8x8x8xbf16>
    %49 = vector.extract_strided_slice %46 {offsets = [8, 0, 0], sizes = [8, 8, 8], strides = [1, 1, 1]} : vector<24x8x8xf32> to vector<8x8x8xf32>
    %50 = arith.truncf %49 : vector<8x8x8xf32> to vector<8x8x8xbf16>
    %51 = vector.extract_strided_slice %46 {offsets = [16, 0, 0], sizes = [8, 8, 8], strides = [1, 1, 1]} : vector<24x8x8xf32> to vector<8x8x8xf32>
    %52 = arith.truncf %51 : vector<8x8x8xf32> to vector<8x8x8xbf16>
    "tpu.trace_start"() <{level = 10 : i32, message = "gqe,gke->gqk"}> : () -> ()
    %cst_18 = arith.constant dense<0.000000e+00> : vector<8x8x8xf32>
    %53 = tpu.matmul %48, %50, %cst_18 {dimension_numbers = #tpu.dot_dimension_numbers<[2], [2], [1], [1], [0, 0, 0, 1, 1, 1], [0], [0]>} : vector<8x8x8xbf16>, vector<8x8x8xbf16>, vector<8x8x8xf32> -> vector<8x8x8xf32>
    "tpu.trace_stop"() : () -> ()
    %cst_19 = arith.constant 0.353553385 : f32
    %54 = vector.broadcast %cst_19 : f32 to vector<8x8x8xf32>
    %55 = arith.mulf %53, %54 : vector<8x8x8xf32>
    %56 = tpu.iota {dimensions = array<i32: 0>} : vector<8x8xi32>
    %57 = tpu.iota {dimensions = array<i32: 1>} : vector<8x8xi32>
    %58 = arith.cmpi sle, %57, %56 : vector<8x8xi32>
    %59 = vector.shape_cast %58 : vector<8x8xi1> to vector<1x8x8xi1>
    %cst_20 = arith.constant -1.000000e+09 : f32
    %60 = vector.shape_cast %59 : vector<1x8x8xi1> to vector<1x8x8xi1>
    %61 = vector.broadcast %60 : vector<1x8x8xi1> to vector<8x8x8xi1>
    %62 = vector.broadcast %cst_20 : f32 to vector<8x8x8xf32>
    %63 = arith.select %61, %55, %62 : vector<8x8x8xi1>, vector<8x8x8xf32>
    %cst_21 = arith.constant dense<0xFF800000> : vector<8x8xf32>
    %64 = vector.multi_reduction <maximumf>, %63, %cst_21 [2] : vector<8x8x8xf32> to vector<8x8xf32>
    %65 = vector.shape_cast %64 : vector<8x8xf32> to vector<8x8x1xf32>
    %66 = vector.broadcast %65 : vector<8x8x1xf32> to vector<8x8x8xf32>
    %67 = arith.subf %63, %66 : vector<8x8x8xf32>
    %68 = math.exp %67 : vector<8x8x8xf32>
    %cst_22 = arith.constant dense<0.000000e+00> : vector<8x8xf32>
    %69 = vector.multi_reduction <add>, %68, %cst_22 [2] : vector<8x8x8xf32> to vector<8x8xf32>
    %70 = vector.shape_cast %69 : vector<8x8xf32> to vector<8x8x1xf32>
    %71 = tpu.reciprocal %70 {approx = true} : vector<8x8x1xf32> -> vector<8x8x1xf32>
    %72 = vector.broadcast %71 : vector<8x8x1xf32> to vector<8x8x8xf32>
    %73 = arith.mulf %68, %72 : vector<8x8x8xf32>
    %74 = arith.truncf %73 : vector<8x8x8xf32> to vector<8x8x8xbf16>
    "tpu.trace_start"() <{level = 10 : i32, message = "gqk,gke->gqe"}> : () -> ()
    %cst_23 = arith.constant dense<0.000000e+00> : vector<8x8x8xf32>
    %75 = tpu.matmul %74, %52, %cst_23 {dimension_numbers = #tpu.dot_dimension_numbers<[2], [1], [1], [2], [0, 0, 0, 1, 1, 2], [0], [0]>} : vector<8x8x8xbf16>, vector<8x8x8xbf16>, vector<8x8x8xf32> -> vector<8x8x8xf32>
    "tpu.trace_stop"() : () -> ()
    %76 = vector.shape_cast %75 : vector<8x8x8xf32> to vector<4x16x8xf32>
    %77 = tpu.transpose %76, [1, 0, 2] : vector<4x16x8xf32> -> vector<16x4x8xf32>
    %78 = vector.shape_cast %77 : vector<16x4x8xf32> to vector<16x32xf32>
    %79 = arith.truncf %78 : vector<16x32xf32> to vector<16x32xbf16>
    %c0_24 = arith.constant 0 : index
    %c0_25 = arith.constant 0 : index
    %c0_26 = arith.constant 0 : index
    %80 = vector.load %arg6[%c0_24, %c0_25, %c0_26] : memref<1x32x128xbf16, #tpu.memory_space<vmem>>, vector<1x32x128xbf16>
    %81 = vector.shape_cast %80 : vector<1x32x128xbf16> to vector<32x128xbf16>
    %cst_27 = arith.constant dense<0.000000e+00> : vector<16x128xf32>
    %82 = tpu.matmul %79, %81, %cst_27 {dimension_numbers = #tpu.dot_dimension_numbers<[1], [0], [0], [1], [0, 0, 1, 1], [], []>} : vector<16x32xbf16>, vector<32x128xbf16>, vector<16x128xf32> -> vector<16x128xf32>
    %83 = vector.extract_strided_slice %9 {offsets = [2, 0], sizes = [1, 128], strides = [1, 1]} : vector<4x128xf32> to vector<1x128xf32>
    %84 = vector.broadcast %83 : vector<1x128xf32> to vector<16x128xf32>
    %85 = arith.addf %82, %84 : vector<16x128xf32>
    %86 = arith.addf %4, %85 : vector<16x128xf32>
    %87 = arith.truncf %86 : vector<16x128xf32> to vector<16x128xbf16>
    %c0_28 = arith.constant 0 : index
    %c0_29 = arith.constant 0 : index
    %c0_30 = arith.constant 0 : index
    %88 = vector.load %arg7[%c0_28, %c0_29, %c0_30] : memref<1x128x128xbf16, #tpu.memory_space<vmem>>, vector<1x128x128xbf16>
    %89 = vector.shape_cast %88 : vector<1x128x128xbf16> to vector<128x128xbf16>
    %cst_31 = arith.constant dense<0.000000e+00> : vector<16x128xf32>
    %90 = tpu.matmul %87, %89, %cst_31 {dimension_numbers = #tpu.dot_dimension_numbers<[1], [0], [0], [1], [0, 0, 1, 1], [], []>} : vector<16x128xbf16>, vector<128x128xbf16>, vector<16x128xf32> -> vector<16x128xf32>
    %c0_32 = arith.constant 0 : index
    %c0_33 = arith.constant 0 : index
    %c0_34 = arith.constant 0 : index
    %91 = vector.load %arg8[%c0_32, %c0_33, %c0_34] : memref<1x1x128xf32, #tpu.memory_space<vmem>>, vector<1x1x128xf32>
    %92 = vector.shape_cast %91 : vector<1x1x128xf32> to vector<1x128xf32>
    %93 = vector.broadcast %92 : vector<1x128xf32> to vector<16x128xf32>
    %94 = arith.addf %90, %93 : vector<16x128xf32>
    %cst_35 = arith.constant 5.000000e-01 : f32
    %95 = vector.broadcast %cst_35 : f32 to vector<16x128xf32>
    %96 = arith.mulf %95, %94 : vector<16x128xf32>
    %cst_36 = arith.constant 0.707106769 : f32
    %97 = vector.broadcast %cst_36 : f32 to vector<16x128xf32>
    %98 = arith.mulf %94, %97 : vector<16x128xf32>
    %cst_37 = arith.constant 0.000000e+00 : f32
    %99 = vector.broadcast %cst_37 : f32 to vector<16x128xf32>
    %100 = arith.cmpf oge, %98, %99 : vector<16x128xf32>
    %cst_38 = arith.constant 1.000000e+00 : f32
    %cst_39 = arith.constant -1.000000e+00 : f32
    %101 = vector.broadcast %cst_38 : f32 to vector<16x128xf32>
    %102 = vector.broadcast %cst_39 : f32 to vector<16x128xf32>
    %103 = arith.select %100, %101, %102 : vector<16x128xi1>, vector<16x128xf32>
    %104 = math.absf %98 : vector<16x128xf32>
    %cst_40 = arith.constant 0.327591091 : f32
    %105 = vector.broadcast %cst_40 : f32 to vector<16x128xf32>
    %106 = arith.mulf %105, %104 : vector<16x128xf32>
    %cst_41 = arith.constant 1.000000e+00 : f32
    %107 = vector.broadcast %cst_41 : f32 to vector<16x128xf32>
    %108 = arith.addf %107, %106 : vector<16x128xf32>
    %cst_42 = arith.constant 1.000000e+00 : f32
    %109 = vector.broadcast %cst_42 : f32 to vector<16x128xf32>
    %110 = arith.divf %109, %108 : vector<16x128xf32>
    %cst_43 = arith.constant 1.06140542 : f32
    %111 = vector.broadcast %cst_43 : f32 to vector<16x128xf32>
    %112 = arith.mulf %111, %110 : vector<16x128xf32>
    %cst_44 = arith.constant -1.45315206 : f32
    %113 = vector.broadcast %cst_44 : f32 to vector<16x128xf32>
    %114 = arith.addf %112, %113 : vector<16x128xf32>
    %115 = arith.mulf %114, %110 : vector<16x128xf32>
    %cst_45 = arith.constant 1.42141378 : f32
    %116 = vector.broadcast %cst_45 : f32 to vector<16x128xf32>
    %117 = arith.addf %115, %116 : vector<16x128xf32>
    %118 = arith.mulf %117, %110 : vector<16x128xf32>
    %cst_46 = arith.constant -0.284496725 : f32
    %119 = vector.broadcast %cst_46 : f32 to vector<16x128xf32>
    %120 = arith.addf %118, %119 : vector<16x128xf32>
    %121 = arith.mulf %120, %110 : vector<16x128xf32>
    %cst_47 = arith.constant 0.254829586 : f32
    %122 = vector.broadcast %cst_47 : f32 to vector<16x128xf32>
    %123 = arith.addf %121, %122 : vector<16x128xf32>
    %124 = arith.mulf %123, %110 : vector<16x128xf32>
    %cst_48 = arith.constant 0.000000e+00 : f32
    %125 = vector.broadcast %cst_48 : f32 to vector<16x128xf32>
    %126 = arith.subf %125, %104 : vector<16x128xf32>
    %127 = arith.mulf %126, %104 : vector<16x128xf32>
    %128 = math.exp %127 : vector<16x128xf32>
    %129 = arith.mulf %124, %128 : vector<16x128xf32>
    %cst_49 = arith.constant 1.000000e+00 : f32
    %130 = vector.broadcast %cst_49 : f32 to vector<16x128xf32>
    %131 = arith.subf %130, %129 : vector<16x128xf32>
    %132 = arith.mulf %103, %131 : vector<16x128xf32>
    %cst_50 = arith.constant 1.000000e+00 : f32
    %133 = vector.broadcast %cst_50 : f32 to vector<16x128xf32>
    %134 = arith.addf %133, %132 : vector<16x128xf32>
    %135 = arith.mulf %96, %134 : vector<16x128xf32>
    %136 = arith.truncf %135 : vector<16x128xf32> to vector<16x128xbf16>
    %c0_51 = arith.constant 0 : index
    %c0_52 = arith.constant 0 : index
    %c0_53 = arith.constant 0 : index
    %137 = vector.load %arg9[%c0_51, %c0_52, %c0_53] : memref<1x128x128xbf16, #tpu.memory_space<vmem>>, vector<1x128x128xbf16>
    %138 = vector.shape_cast %137 : vector<1x128x128xbf16> to vector<128x128xbf16>
    %cst_54 = arith.constant dense<0.000000e+00> : vector<16x128xf32>
    %139 = tpu.matmul %136, %138, %cst_54 {dimension_numbers = #tpu.dot_dimension_numbers<[1], [0], [0], [1], [0, 0, 1, 1], [], []>} : vector<16x128xbf16>, vector<128x128xbf16>, vector<16x128xf32> -> vector<16x128xf32>
    %140 = vector.extract_strided_slice %9 {offsets = [3, 0], sizes = [1, 128], strides = [1, 1]} : vector<4x128xf32> to vector<1x128xf32>
    %141 = vector.broadcast %140 : vector<1x128xf32> to vector<16x128xf32>
    %142 = arith.addf %139, %141 : vector<16x128xf32>
    %143 = arith.addf %86, %142 : vector<16x128xf32>
    %144 = vector.shape_cast %143 : vector<16x128xf32> to vector<2x8x128xf32>
    %c0_55 = arith.constant 0 : index
    %c0_56 = arith.constant 0 : index
    %c0_57 = arith.constant 0 : index
    %145 = vector.load %arg10[%c0_55, %c0_56, %c0_57] : memref<2x8x128xf32, #tpu.memory_space<vmem>>, vector<2x8x128xf32>
    tpu.vector_store %arg10[%c0_55, %c0_56, %c0_57], %144 {strides = array<i32>} : memref<2x8x128xf32, #tpu.memory_space<vmem>>, vector<2x8x128xf32>,
    return
  }
  func.func @transform_0(%arg0: i32, %arg1: i32) -> (i32, i32, i32) {
    %c0_i32 = arith.constant 0 : i32
    %c0_i32_0 = arith.constant 0 : i32
    %c0_i32_1 = arith.constant 0 : i32
    return %arg0, %c0_i32, %c0_i32_0 : i32, i32, i32
  }
  func.func @transform_1(%arg0: i32, %arg1: i32) -> (i32, i32, i32) {
    %c0_i32 = arith.constant 0 : i32
    %c0_i32_0 = arith.constant 0 : i32
    %c0_i32_1 = arith.constant 0 : i32
    return %arg1, %c0_i32, %c0_i32_0 : i32, i32, i32
  }
  func.func @transform_2(%arg0: i32, %arg1: i32) -> (i32, i32, i32) {
    %c0_i32 = arith.constant 0 : i32
    %c0_i32_0 = arith.constant 0 : i32
    %c0_i32_1 = arith.constant 0 : i32
    return %arg1, %c0_i32, %c0_i32_0 : i32, i32, i32
  }
  func.func @transform_3(%arg0: i32, %arg1: i32) -> (i32, i32, i32) {
    %c0_i32 = arith.constant 0 : i32
    %c0_i32_0 = arith.constant 0 : i32
    %c0_i32_1 = arith.constant 0 : i32
    return %arg1, %c0_i32, %c0_i32_0 : i32, i32, i32
  }
  func.func @transform_4(%arg0: i32, %arg1: i32) -> (i32, i32, i32) {
    %c0_i32 = arith.constant 0 : i32
    %c0_i32_0 = arith.constant 0 : i32
    %c0_i32_1 = arith.constant 0 : i32
    return %arg1, %c0_i32, %c0_i32_0 : i32, i32, i32
  }
  func.func @transform_5(%arg0: i32, %arg1: i32) -> (i32, i32, i32) {
    %c0_i32 = arith.constant 0 : i32
    %c0_i32_0 = arith.constant 0 : i32
    %c0_i32_1 = arith.constant 0 : i32
    return %arg1, %c0_i32, %c0_i32_0 : i32, i32, i32
  }
  func.func @transform_6(%arg0: i32, %arg1: i32) -> (i32, i32, i32) {
    %c0_i32 = arith.constant 0 : i32
    %c0_i32_0 = arith.constant 0 : i32
    %c0_i32_1 = arith.constant 0 : i32
    return %arg1, %c0_i32, %c0_i32_0 : i32, i32, i32
  }
  func.func @transform_7(%arg0: i32, %arg1: i32) -> (i32, i32, i32) {
    %c0_i32 = arith.constant 0 : i32
    %c0_i32_0 = arith.constant 0 : i32
    %c0_i32_1 = arith.constant 0 : i32
    return %arg1, %c0_i32, %c0_i32_0 : i32, i32, i32
  }
  func.func @transform_8(%arg0: i32, %arg1: i32) -> (i32, i32, i32) {
    %c0_i32 = arith.constant 0 : i32
    %c0_i32_0 = arith.constant 0 : i32
    %c0_i32_1 = arith.constant 0 : i32
    return %arg0, %c0_i32, %c0_i32_0 : i32, i32, i32
  }
}

</mosaic_0001>

<bundles_post_ra>
// kernel: tpu_custom_call.1
= control target key start
LH: loop header
LB: loop body
LE: loop exit
PB: predicated region body
PF: predicated region fallthrough
CT: control target
= control target key end

     0   :  { %s3743_s0 = inlined_call_operand.vmem [shape: f32[2,8,128], index: 0, kind: input, shape index: {}]   ;;  %s3744_s1 = inlined_call_operand.vmem [shape: f32[2,4,128], index: 1, kind: input, shape index: {}]   ;;  %s3745_s2 = inlined_call_operand.vmem [shape: bf16[2,128,96], index: 2, kind: input, shape index: {}]   ;;  %s3746_s3 = inlined_call_operand.vmem [shape: f32[2,1,96], index: 3, kind: input, shape index: {}]   ;;  %s3747_s4 = inlined_call_operand.vmem [shape: bf16[2,32,128], index: 4, kind: input, shape index: {}]   ;;  %s3748_s5 = inlined_call_operand.vmem [shape: bf16[2,128,128], index: 5, kind: input, shape index: {}]   ;;  %s3749_s6 = inlined_call_operand.vmem [shape: f32[2,1,128], index: 6, kind: input, shape index: {}]   ;;  %s3750_s7 = inlined_call_operand.hbm [shape: bf16[2,128,128], index: 7, kind: input, shape index: {}]   ;;  %s3751_s8 = inlined_call_operand.hbm [shape: f32[2,8,128], index: 8, kind: output, shape index: {}]  }
   0x1   :  { %3755 = sst [smem:[#allocation11_spill]] %s3750_s7 }
   0x2   :  { %13 = vsyncpa [#allocation3], 0 }
   0x3   :  { %15 = vsyncpa [#allocation3 + $0x1], 0 }
   0x4   :  { %16 = vsyncpa [#allocation4], 0  ;;  %s3002_s27 = smov 0   ;;  %s3004_s28 = smov 0  }
   0x5   :  { %s3006_s29 = smov 0   ;;  %s3008_s30 = smov 0  }
   0x6   :  { %s3010_s9 = smov 0   ;;  %s3012_s10 = smov 0  }
   0x7 LB: > { %3756 = sst [smem:[#allocation8_spill]] %s2930_s9  ;;  %s3752_s11 = sadd.s32 4294967295, %s2934_s10   ;;  %s2934_s10 = sphi %s3012_s10, %s22_s10   ;;  %s2930_s9 = sphi %s3010_s9, %s3767_s9   ;;  %s2926_s30 = sphi %s3008_s30, %s3766_s30   ;;  %s2922_s29 = sphi %s3006_s29, %s3770_s29   ;;  %s2918_s28 = sphi %s3004_s28, %s3769_s28   ;;  %s2914_s27 = sphi %s3002_s27, %s3768_s27  }
   0x8   : > { %s31_s12 = sadd.s32 1, %s2930_s9  ;;  %s223_s13 = sadd.s32 1, %s2922_s29 }
   0x9   : > { %p32_p0 = scmp.ge.s32.totalorder %s31_s12, 2  ;;  %p230_p1 = scmp.ne.s32.totalorder %s2922_s29, %s2918_s28 }
   0xa   : > { %p231_p2 = scmp.eq.s32.totalorder %s2934_s10, 0  ;;  %p236_p4 = scmp.ne.s32.totalorder %s2918_s28, %s2914_s27 }
   0xb   : > { %s3772_s12 = smov (%p32_p0, %s31_s12), 0  ;;  %p237_p5 = scmp.eq.s32.totalorder %s3752_s11, 0 }
   0xc   : > { %3757 = sst [smem:[#allocation9_spill]] %s3772_s12  ;;  %p3038_p3 = por %p231_p2, %p230_p1 }
   0xd   : > { %s220_s15 = ssub.s32 %s2930_s9, %s3772_s12  ;;  %p3047_p7 = por %p237_p5, %p236_p4 }
   0xe   : > { %p221_p6 = scmp.eq.s32.totalorder %s220_s15, 0  ;;  %p2666_p8 = scmp.lt.s32.totalorder %s2934_s10, 2 }
   0xf   : > { %s338_s18 = sand.u32 1, %s2922_s29   ;;  %s2626_s19 = sshll.u32 %s2930_s9, 6 }
  0x10   : > { %s3053_s17 = scalar_select %p221_p6, %s2922_s29, %s223_s13  }
  0x11   : > { %s2488_s20 = sshll.u32 %s338_s18, 6  ;;  %s3761_s7 = sld [smem:[#allocation11_spill]] }
  0x12   : > { %3760 = sst [smem:[#allocation10_spill]] %s3053_s17  ;;  %s342_s25 = scalar_lea.vmem [#allocation2], %s2488_s20 }
  0x13   : > { %s350_s26 = sshll.u32 %s342_s25, 4  ;;  %p2663_p9 = pnand %p2666_p8, %p3038_p3  ;;  %s351_s26 = int_to_ptr.vmem [resolvable:$true] %s350_s26 }
  0x14   : > { %p2491_p10 = scmp.ge.s32.totalorder %s2934_s10, 1  ;;  %p358_p11 = scmp.lt.s32.totalorder %s2934_s10, 3 }
  0x15   : > { %s339_s27 = scalar_lea.sflag [#allocation3], %s338_s18  ;;  %s2936_s15 = smov 64  }
  0x16   : > { %s2937_s13 = smov 4   ;;  %p359_p12 = pnand %p2491_p10, %p358_p11 }
  0x17   : > { %s347_s23 = scalar_lea.hbm %s3761_s7, %s2626_s19  ;;  %s364_s11 = sand.u32 (!%p359_p12), 1, %s2918_s28  }
  0x18   : > { %s348_s24 = sshll.u32 %s347_s23, 4  ;;  %362 = sbr.rel (%p359_p12) target bundleno = 1866 (0x74a), region = 52  ;;  %s349_s24 = int_to_ptr.hbm [resolvable:$true] %s348_s24 }
  0x19   : > { %2665 = dma.hbm_to_vmem [thread:$0]  (!%p2663_p9), %s349_s24, 1024, %s351_s26, %s339_s27, %s2936_s15, %s2936_s15, %s2937_s13  }
  0x1a   : > { %s2492_s21 = sshll.u32 (!%p359_p12), %s364_s11, 6  ;;  %s365_s19 = scalar_lea.sflag (!%p359_p12), [#allocation3], %s364_s11 }
  0x1b   : > { %s3065_s22 = scalar_lea.vmem (!%p359_p12), [#allocation2], %s2492_s21 }
  0x1d   : > { %2905 = dma.done.wait (%p3047_p7), %s365_s19, 1024  }
  0x1e   : > { %2907 = vsyncadd (%p3047_p7), %s365_s19, 4294966272  ;;  %p433_p13 = scmp.lt.s32.totalorder %s2926_s30, 1  ;;  %p2500_p0 = scmp.ne.s32.totalorder %s2926_s30, 0 }
  0x20   : > { %s3073_s14 = scalar_select %p433_p13, %s2926_s30, 1 }
  0x22   : > { %s2493_s18 = sshll.u32 %s3073_s14, 2  ;;  %s2627_s20 = sshll.u32 %s3073_s14, 6 }
  0x23   : > { %s3080_s24 = scalar_lea.vmem %s3744_s1, %s2493_s18  ;;  %s3085_s26 = scalar_lea.vmem %s3745_s2, %s2627_s20 }
  0x24   : > { %s444_s13 = scalar_lea.vmem %s3746_s3, %s3073_s14  ;;  %s2628_s21 = sshll.u32 %s3073_s14, 4 }
  0x25   : > { %s3095_s12 = scalar_lea.vmem %s3747_s4, %s2628_s21  ;;  %s3100_s18 = scalar_lea.vmem %s3748_s5, %s2627_s20 }
  0x26   : > { %s457_s25 = scalar_lea.vmem %s3749_s6, %s3073_s14  ;;  %463 = sbr.rel (%p2500_p0) target bundleno = 46 (0x2e), region = 60 }
  0x2b   : > { %v464_v0 = vld [vmem:[%s3743_s0] sm:$0xff]  ;;  %v465_v1 = vld [vmem:[%s3743_s0 + $0x8] sm:$0xff] }
  0x2c   : > { %466 = vst [vmem:[#allocation5] sm:$0xff] %v464_v0 }
  0x2d   : > { %467 = vst [vmem:[#allocation5 + $0x8] sm:$0xff] %v465_v1 }
  0x2e PF: > { %v470_v4 = vlaneseq  ;;  %v2637_v18 = vld [vmem:[%s3085_s26 + $0x38] sm:$0xff]  ;;  %v2636_v19 = vld [vmem:[%s3085_s26 + $0x30] sm:$0xff]  ;;  %v2635_v20 = vld [vmem:[%s3085_s26 + $0x28] sm:$0xff]  ;;  %s2938_s17 = smov 112   ;;  %s2939_s20 = smov 88   ;;  %vm676_vm8 = vcmask 1047556  }
  0x2f   : > { %593 = vmatpush.bf16.msra.mxu0 %v2637_v18  ;;  %v2634_v21 = vld [vmem:[%s3085_s26 + $0x20] sm:$0xff]  ;;  %v2633_v22 = vld [vmem:[%s3085_s26 + $0x18] sm:$0xff]  ;;  %v2632_v23 = vld [vmem:[%s3085_s26 + $0x10] sm:$0xff]  ;;  %s2942_s21 = smov 72   ;;  %s2943_s19 = smov 96   ;;  %vm1368_vm9 = vcmask 64512  }
  0x30   : > { %v471_v5 = vand.u32 127, %v470_v4  ;;  %v1530_v6 = vshrl.u32 %v470_v4, 7  ;;  %v2631_v24 = vld [vmem:[%s3085_s26 + $0x8] sm:$0xff]  ;;  %v2630_v26 = vld [vmem:[%s3085_s26] sm:$0xff]  ;;  %s2940_s26 = smov 120   ;;  %s2944_s11 = smov 80  }
  0x31   : > { %v473_v42 = vld [vmem:[%s3080_s24] sm:$0xf]  ;;  %v2945_v63 = vmov 1983009808   ;;  %s2947_s23 = smov 48   ;;  %s2948_s16 = smov 56  }
  0x32   : > { %vm3113_vm0 = vcmp.le.s32.totalorder %v471_v5, %v1530_v6  ;;  %vm472_vm1 = vcmp.lt.s32.totalorder %v471_v5, 32  ;;  %v518_v46 = vperm.slane %v473_v42, 0  ;;  %v521_v51 = vperm.slane %v473_v42, 1  ;;  %v2773_v56 = vld [vmem:[%s444_s13] ss:$0 sm:$0xff]  ;;  %s2941_s13 = smov 104  }
  0x33   : > { %v468_v2 = vld [vmem:[#allocation5] sm:$0xff]  ;;  %594 = vmatpush.bf16.msra.mxu0 %v2636_v19  ;;  %v681_v0 = vunpack.c.l.s4 %v2945_v63  ;;  %s2949_s27 = smov 40   ;;  %s2950_s15 = smov 64   ;;  %vm1641_vm10 = vcmask 1043456   ;;  %vm2037_vm11 = vcmask 130048   ;;  %vm2040_vm12 = vcmask 195584  }
  0x34   : > { %474 = vadd.xlane.f32.xlu0 %v468_v2  ;;  %v469_v3 = vld [vmem:[#allocation5 + $0x8] sm:$0xff]  ;;  %s2951_s7 = smov 16   ;;  %s2952_s30 = smov 24   ;;  %vm2061_vm13 = vcmask 261120  }
  0x35   : > { %v3149_v4 = vunpack.c.0.s8 %v681_v0  ;;  %s2953_s9 = smov 8  }
  0x37   : > { %595 = vmatpush.bf16.msra.mxu0 %v2635_v20 }
  0x3b   : > { %596 = vmatpush.bf16.msra.mxu0 %v2634_v21 }
  0x3c   : > { %476 = vadd.xlane.f32.xlu0 %v469_v3 }
  0x3f   : > { %597 = vmatpush.bf16.msra.mxu0 %v2633_v22 }
  0x43   : > { %598 = vmatpush.bf16.msra.mxu0 %v2632_v23 }
  0x47   : > { %599 = vmatpush.bf16.msra.mxu0 %v2631_v24 }
  0x4b   : > { %600 = vmatpush.bf16.msra.mxu0 %v2630_v26 }
  0xa7   : > { %v475_v8 = vpop.xlane.xlu0 %474 }
  0xa8   : > { %v478_v9 = vmul.f32 0.03125, %v475_v8 }
  0xaa   : > { %v480_v10 = vsub.f32 %v468_v2, %v478_v9 }
  0xac   : > { %v484_v11 = vsel %vm472_vm1, %v480_v10, 0.0 }
  0xad   : > { %v486_v12 = vmul.f32 %v484_v11, %v484_v11 }
  0xaf   : > { %488 = vadd.xlane.f32.xlu1 %v486_v12  ;;  %v477_v13 = vpop.xlane.xlu0 %476 }
  0xb0   : > { %v479_v14 = vmul.f32 0.03125, %v477_v13 }
  0xb2   : > { %v481_v15 = vsub.f32 %v469_v3, %v479_v14 }
  0xb4   : > { %v485_v16 = vsel %vm472_vm1, %v481_v15, 0.0 }
  0xb5   : > { %v487_v17 = vmul.f32 %v485_v16, %v485_v16 }
  0xb7   : > { %490 = vadd.xlane.f32.xlu1 %v487_v17  ;;  %v2946_v17 = vmov 1934713408  }
  0xb8   : > { %v729_v18 = vunpack.c.l.s4 %v2946_v17 }
 0x122   : > { %v489_v25 = vpop.xlane.xlu1 %488 }
 0x123   : > { %v492_v27 = vmul.f32 0.03125, %v489_v25 }
 0x125   : > { %v494_v28 = vadd.f32 1e-05, %v492_v27  ;;  %v3162_v27 = vunpack.c.0.s8 %v729_v18 }
 0x127   : > { %2775 = vrsqrt.f32 %v494_v28  ;;  %vm502_vm3 = vweird.f32 %v494_v28 }
 0x12a   : > { %v491_v29 = vpop.xlane.xlu1 %490 }
 0x12b   : > { %v493_v30 = vmul.f32 0.03125, %v491_v29 }
 0x12d   : > { %v2776_v31 = vpop.eup %2775  ;;  %v495_v32 = vadd.f32 1e-05, %v493_v30 }
 0x12e   : > { %v497_v33 = vmul.f32 %v2776_v31, %v494_v28  ;;  %vm503_vm2 = vweird.f32 %v2776_v31 }
 0x12f   : > { %2777 = vrsqrt.f32 %v495_v32  ;;  %vm504_vm4 = vmor %vm502_vm3, %vm503_vm2  ;;  %vm512_vm6 = vweird.f32 %v495_v32 }
 0x130   : > { %v498_v34 = vmul.f32 %v2776_v31, %v497_v33 }
 0x132   : > { %v499_v35 = vmul.f32 0.5, %v498_v34 }
 0x134   : > { %v500_v36 = vsub.f32 1.5, %v499_v35 }
 0x135   : > { %v2778_v37 = vpop.eup %2777 }
 0x136   : > { %v501_v38 = vmul.f32 %v2776_v31, %v500_v36  ;;  %v507_v39 = vmul.f32 %v2778_v37, %v495_v32  ;;  %vm513_vm5 = vweird.f32 %v2778_v37 }
 0x137   : > { %vm514_vm7 = vmor %vm512_vm6, %vm513_vm5 }
 0x138   : > { %v508_v40 = vmul.f32 %v2778_v37, %v507_v39  ;;  %v505_v43 = vsel %vm504_vm4, %v2776_v31, %v501_v38 }
 0x139   : > { %v516_v45 = vmul.f32 %v505_v43, %v484_v11 }
 0x13a   : > { %v509_v41 = vmul.f32 0.5, %v508_v40 }
 0x13b   : > { %v519_v50 = vmul.f32 %v518_v46, %v516_v45 }
 0x13c   : > { %v510_v44 = vsub.f32 1.5, %v509_v41 }
 0x13d   : > { %v522_v53 = vadd.f32 %v521_v51, %v519_v50 }
 0x13e   : > { %v511_v47 = vmul.f32 %v2778_v37, %v510_v44 }
 0x140   : > { %v515_v48 = vsel %vm514_vm7, %v2778_v37, %v511_v47 }
 0x141   : > { %v517_v49 = vmul.f32 %v515_v48, %v485_v16 }
 0x143   : > { %v520_v52 = vmul.f32 %v518_v46, %v517_v49 }
 0x145   : > { %v523_v54 = vadd.f32 %v521_v51, %v520_v52 }
 0x147   : > { %v524_v55 = vpack.c.bf16 %v523_v54, %v522_v53 }
 0x149   : > { %601 = vmatmul.bf16.vlgmr.msra.gmra.mxu0 %v524_v55 }
 0x1c6   : > { %v602_v57 = vpop.f32.mrf.mxu0 }
 0x1c7   : > { %v3131_v58 = vadd.f32 %v2773_v56, %v602_v57 }
 0x1c9   : > { %615 = vrot.lane.b32.xlu1 %v3131_v58, %s2938_s17  ;;  %633 = vrot.lane.b32.xlu0 %v3131_v58, %s2939_s20  ;;  %v678_v8 = vrot.slane %v3131_v58, 4 }
 0x1ca   : > { %609 = vrot.lane.b32.xlu2 %v3131_v58, %s2940_s26 }
 0x1ce   : > { %v604_v59 = vpop.f32.mrf.mxu0 }
 0x1cf   : > { %v3136_v60 = vadd.f32 %v2773_v56, %v604_v59 }
 0x1d1   : > { %635 = vrot.lane.b32.xlu1 %v3136_v60, %s2939_s20  ;;  %611 = vrot.lane.b32.xlu0 %v3136_v60, %s2940_s26  ;;  %v846_v48 = vrot.slane %v3136_v60, 4  ;;  %s3764_s20 = sadd.s32 4294967295, %s2934_s10   ;;  %s2956_s26 = smov 128  }
 0x1d2   : > { %621 = vrot.lane.b32.xlu2 %v3131_v58, %s2941_s13  ;;  %p2667_p1 = scmp.eq.s32.totalorder %s3764_s20, 1 }
 0x1d9   : > { %647 = vrot.lane.b32.xlu1 %v3136_v60, %s2942_s21  ;;  %617 = vrot.lane.b32.xlu0 %v3136_v60, %s2938_s17  ;;  %s2338_s17 = sshll.u32 %s3751_s8, 4  ;;  %s2339_s17 = int_to_ptr.hbm [resolvable:$true] %s2338_s17 }
 0x1da   : > { %627 = vrot.lane.b32.xlu2 %v3131_v58, %s2943_s19 }
 0x1e1   : > { %641 = vrot.lane.b32.xlu0 %v3136_v60, %s2944_s11 }
 0x1e2   : > { %645 = vrot.lane.b32.xlu2 %v3131_v58, %s2942_s21 }
 0x1ea   : > { %639 = vrot.lane.b32.xlu2 %v3131_v58, %s2944_s11 }
 0x1f2   : > { %623 = vrot.lane.b32.xlu2 %v3136_v60, %s2941_s13 }
 0x1fa   : > { %629 = vrot.lane.b32.xlu2 %v3136_v60, %s2943_s19 }
 0x224   : > { %v610_v61 = vpop.permute.xlu2 %609 }
 0x225   : > { %v690_v3 = vrot.slane %v610_v61, 4 }
 0x22c   : > { %v622_v62 = vpop.permute.xlu2 %621 }
 0x22d   : > { %v688_v2 = vrot.slane %v622_v62, 4  ;;  %v691_v5 = vsel %vm676_vm8, %v622_v62, %v690_v3 }
 0x22e   : > { %v699_v9 = vperm.slane %v691_v5, %v3149_v4 }
 0x22f   : > { %v689_v6 = vsel %vm676_vm8, %v688_v2, %v610_v61 }
 0x230   : > { %v695_v12 = vperm.slane %v689_v6, %v3149_v4  ;;  %v736_v25 = vrot.slane %v699_v9, 4 }
 0x232   : > { %v724_v24 = vrot.slane %v695_v12, 4 }
 0x234   : > { %v628_v1 = vpop.permute.xlu2 %627 }
 0x235   : > { %v702_v33 = vrot.slane %v628_v1, 4 }
 0x23b   : > { %v616_v10 = vpop.permute.xlu1 %615  ;;  %v634_v11 = vpop.permute.xlu0 %633 }
 0x23c   : > { %v675_v13 = vrot.slane %v616_v10, 4  ;;  %v679_v14 = vsel %vm676_vm8, %v616_v10, %v678_v8  ;;  %v714_v15 = vrot.slane %v634_v11, 4  ;;  %v646_v16 = vpop.permute.xlu2 %645 }
 0x23d   : > { %v687_v19 = vperm.slane %v679_v14, %v3149_v4  ;;  %v712_v20 = vrot.slane %v646_v16, 4 }
 0x23e   : > { %v677_v21 = vsel %vm676_vm8, %v675_v13, %v3131_v58  ;;  %v715_v23 = vsel %vm676_vm8, %v646_v16, %v714_v15 }
 0x23f   : > { %v683_v22 = vperm.slane %v677_v21, %v3149_v4  ;;  %v738_v26 = vrot.slane %v687_v19, 4  ;;  %v713_v28 = vsel %vm676_vm8, %v712_v20, %v634_v11  ;;  %v737_v31 = vsel %vm676_vm8, %v736_v25, %v687_v19 }
 0x240   : > { %v723_v32 = vperm.slane %v715_v23, %v3149_v4  ;;  %v719_v37 = vperm.slane %v713_v28, %v3149_v4  ;;  %v743_v40 = vperm.slane %v737_v31, %v3162_v27 }
 0x241   : > { %v725_v29 = vsel %vm676_vm8, %v724_v24, %v683_v22  ;;  %v726_v30 = vrot.slane %v683_v22, 4  ;;  %v739_v36 = vsel %vm676_vm8, %v699_v9, %v738_v26 }
 0x242   : > { %v3173_v39 = vperm.slane %v725_v29, %v3162_v27  ;;  %v760_v44 = vrot.slane %v723_v32, 4  ;;  %v747_v46 = vperm.slane %v739_v36, %v3162_v27  ;;  %v748_v49 = vrot.slane %v719_v37, 4 }
 0x243   : > { %v636_v34 = vpop.permute.xlu1 %635  ;;  %v3168_v35 = vpop.permute.xlu0 %611  ;;  %v727_v43 = vsel %vm676_vm8, %v695_v12, %v726_v30  ;;  %v782_v55 = vrot.slane %v743_v40, 4 }
 0x244   : > { %v640_v38 = vpop.permute.xlu2 %639  ;;  %v3185_v53 = vperm.slane %v727_v43, %v3162_v27  ;;  %v774_v54 = vrot.slane %v3173_v39, 4  ;;  %v882_v57 = vrot.slane %v636_v34, 4  ;;  %v786_v6 = vrot.slane %v747_v46, 4 }
 0x245   : > { %v700_v41 = vrot.slane %v640_v38, 4  ;;  %v703_v42 = vsel %vm676_vm8, %v640_v38, %v702_v33  ;;  %v858_v13 = vrot.slane %v3168_v35, 4 }
 0x246   : > { %v711_v45 = vperm.slane %v703_v42, %v3149_v4  ;;  %v778_v12 = vrot.slane %v3185_v53, 4 }
 0x247   : > { %v701_v47 = vsel %vm676_vm8, %v700_v41, %v628_v1 }
 0x248   : > { %v707_v50 = vperm.slane %v701_v47, %v3149_v4  ;;  %v761_v51 = vsel %vm676_vm8, %v760_v44, %v711_v45  ;;  %v762_v52 = vrot.slane %v711_v45, 4 }
 0x249   : > { %v767_v56 = vperm.slane %v761_v51, %v3162_v27 }
 0x24a   : > { %v749_v59 = vsel %vm676_vm8, %v748_v49, %v707_v50  ;;  %v750_v61 = vrot.slane %v707_v50, 4  ;;  %v763_v62 = vsel %vm676_vm8, %v723_v32, %v762_v52 }
 0x24b   : > { %v755_v63 = vperm.slane %v749_v59, %v3162_v27  ;;  %v771_v0 = vperm.slane %v763_v62, %v3162_v27  ;;  %v780_v1 = vrot.slane %v767_v56, 4  ;;  %v3194_v2 = vsel %vm676_vm8, %v767_v56, %v782_v55  ;;  %v648_v3 = vpop.permute.xlu1 %647  ;;  %v618_v5 = vpop.permute.xlu0 %617 }
 0x24c   : > { %v751_v8 = vsel %vm676_vm8, %v719_v37, %v750_v61  ;;  %v880_v9 = vrot.slane %v648_v3, 4  ;;  %v883_v10 = vsel %vm676_vm8, %v648_v3, %v882_v57  ;;  %v624_v11 = vpop.permute.xlu2 %623  ;;  %v1050_v15 = vrot.slane %v3194_v2, 4 }
 0x24d   : > { %v3201_v14 = vsel %vm676_vm8, %v755_v63, %v774_v54  ;;  %v759_v16 = vperm.slane %v751_v8, %v3162_v27  ;;  %v3206_v17 = vsel %vm676_vm8, %v780_v1, %v743_v40  ;;  %v784_v18 = vrot.slane %v771_v0, 4 }
 0x24e   : > { %v3209_v19 = vsel %vm676_vm8, %v771_v0, %v786_v6  ;;  %v772_v20 = vrot.slane %v755_v63, 4  ;;  %v881_v22 = vsel %vm676_vm8, %v880_v9, %v636_v34  ;;  %v891_v23 = vperm.slane %v883_v10, %v3149_v4 }
 0x24f   : > { %v1048_v21 = vrot.slane %v3209_v19, 4  ;;  %v3215_v24 = vsel %vm676_vm8, %v784_v18, %v747_v46  ;;  %v1026_v25 = vrot.slane %v3201_v14, 4  ;;  %v844_v26 = vrot.slane %v618_v5, 4 }
 0x250   : > { %v847_v28 = vsel %vm676_vm8, %v618_v5, %v846_v48  ;;  %v1038_v29 = vrot.slane %v3206_v17, 4  ;;  %v887_v31 = vperm.slane %v881_v22, %v3149_v4  ;;  %v776_v33 = vrot.slane %v759_v16, 4 }
 0x251   : > { %v1049_v30 = vsel %vm676_vm8, %v1048_v21, %v3194_v2  ;;  %v855_v32 = vperm.slane %v847_v28, %v3149_v4  ;;  %v1036_v34 = vrot.slane %v3215_v24, 4  ;;  %v845_v36 = vsel %vm676_vm8, %v844_v26, %v3136_v60 }
 0x252   : > { %v856_v37 = vrot.slane %v624_v11, 4  ;;  %v928_v38 = vrot.slane %v891_v23, 4  ;;  %v851_v40 = vperm.slane %v845_v36, %v3149_v4  ;;  %v859_v42 = vsel %vm676_vm8, %v624_v11, %v858_v13 }
 0x253   : > { %v906_v41 = vrot.slane %v855_v32, 4  ;;  %v642_v43 = vpop.permute.xlu0 %641  ;;  %v3230_v44 = vperm.slane %v1049_v30, %v3149_v4  ;;  %v867_v46 = vperm.slane %v859_v42, %v3149_v4  ;;  %v916_v49 = vrot.slane %v887_v31, 4 }
 0x254   : > { %v857_v45 = vsel %vm676_vm8, %v856_v37, %v3168_v35  ;;  %v868_v47 = vrot.slane %v642_v43, 4  ;;  %v630_v48 = vpop.permute.xlu2 %629  ;;  %v894_v50 = vrot.slane %v851_v40, 4  ;;  %v3238_v54 = vsel %vm676_vm8, %v1036_v34, %v3206_v17 }
 0x255   : > { %v863_v51 = vperm.slane %v857_v45, %v3149_v4  ;;  %v870_v52 = vrot.slane %v630_v48, 4  ;;  %v904_v55 = vrot.slane %v867_v46, 4  ;;  %v773_v57 = vsel %vm676_vm8, %v772_v20, %v3173_v39 }
 0x256   : > { %v869_v56 = vsel %vm676_vm8, %v868_v47, %v630_v48  ;;  %v907_v61 = vsel %vm676_vm8, %v867_v46, %v906_v41  ;;  %v777_v6 = vsel %vm676_vm8, %v776_v33, %v3185_v53  ;;  %v779_v8 = vsel %vm676_vm8, %v759_v16, %v778_v12 }
 0x257   : > { %v892_v35 = vrot.slane %v863_v51, 4  ;;  %v895_v59 = vsel %vm676_vm8, %v863_v51, %v894_v50  ;;  %v871_v62 = vsel %vm676_vm8, %v642_v43, %v870_v52  ;;  %v905_v0 = vsel %vm676_vm8, %v904_v55, %v855_v32 }
 0x258   : > { %v3247_v63 = vperm.slane %v895_v59, %v3162_v27  ;;  %v875_v1 = vperm.slane %v869_v56, %v3149_v4  ;;  %v879_v3 = vperm.slane %v871_v62, %v3149_v4  ;;  %v911_v39 = vperm.slane %v905_v0, %v3162_v27 }
 0x259   : > { %v893_v5 = vsel %vm676_vm8, %v892_v35, %v851_v40  ;;  %v3259_v10 = vperm.slane %v907_v61, %v3162_v27  ;;  %v1014_v33 = vrot.slane %v773_v57, 4  ;;  %v1024_v42 = vrot.slane %v779_v8, 4 }
 0x25a   : > { %v899_v9 = vperm.slane %v893_v5, %v3162_v27  ;;  %v917_v11 = vsel %vm676_vm8, %v916_v49, %v875_v1  ;;  %v918_v13 = vrot.slane %v875_v1, 4  ;;  %v946_v18 = vrot.slane %v3247_v63, 4 }
 0x25b   : > { %v923_v20 = vperm.slane %v917_v11, %v3162_v27  ;;  %v929_v21 = vsel %vm676_vm8, %v928_v38, %v879_v3  ;;  %v930_v22 = vrot.slane %v879_v3, 4  ;;  %v950_v28 = vrot.slane %v911_v39, 4 }
 0x25c   : > { %v942_v26 = vrot.slane %v899_v9, 4  ;;  %v919_v53 = vsel %vm676_vm8, %v887_v31, %v918_v13  ;;  %v935_v12 = vperm.slane %v929_v21, %v3162_v27  ;;  %v954_v34 = vrot.slane %v3259_v10, 4 }
 0x25d   : > { %v927_v16 = vperm.slane %v919_v53, %v3162_v27  ;;  %v931_v30 = vsel %vm676_vm8, %v891_v23, %v930_v22  ;;  %v940_v32 = vrot.slane %v923_v20, 4  ;;  %v1012_v31 = vrot.slane %v777_v6, 4 }
 0x25e   : > { %v939_v36 = vperm.slane %v931_v30, %v3162_v27  ;;  %v943_v37 = vsel %vm676_vm8, %v923_v20, %v942_v26  ;;  %v948_v38 = vrot.slane %v935_v12, 4  ;;  %v3274_v41 = vsel %vm676_vm8, %v935_v12, %v950_v28 }
 0x25f   : > { %v947_v40 = vsel %vm676_vm8, %v927_v16, %v946_v18  ;;  %v3277_v43 = vsel %vm676_vm8, %v940_v32, %v899_v9  ;;  %v944_v23 = vrot.slane %v927_v16, 4  ;;  %v1138_v46 = vrot.slane %v943_v37, 4 }
 0x260   : > { %v955_v45 = vsel %vm676_vm8, %v939_v36, %v954_v34  ;;  %v3281_v47 = vsel %vm676_vm8, %v948_v38, %v911_v39  ;;  %v1136_v48 = vrot.slane %v947_v40, 4  ;;  %v1015_v50 = vsel %vm676_vm8, %v777_v6, %v1014_v33 }
 0x261   : > { %v1160_v49 = vrot.slane %v955_v45, 4  ;;  %v952_v51 = vrot.slane %v939_v36, 4  ;;  %v1027_v52 = vsel %vm676_vm8, %v779_v8, %v1026_v25  ;;  %v1039_v55 = vsel %vm676_vm8, %v3215_v24, %v1038_v29 }
 0x262   : > { %v1051_v56 = vsel %vm676_vm8, %v3209_v19, %v1050_v15  ;;  %v1137_v35 = vsel %vm676_vm8, %v1136_v48, %v943_v37  ;;  %v1023_v61 = vperm.slane %v1015_v50, %v3149_v4  ;;  %v1035_v62 = vperm.slane %v1027_v52, %v3149_v4 }
 0x263   : > { %v1161_v59 = vsel %vm676_vm8, %v1160_v49, %v3274_v41  ;;  %v1126_v25 = vrot.slane %v3277_v43, 4  ;;  %v1162_v17 = vrot.slane %v3274_v41, 4  ;;  %v1047_v24 = vperm.slane %v1039_v55, %v3149_v4 }
 0x264   : > { %v1059_v2 = vperm.slane %v1051_v56, %v3149_v4  ;;  %v3305_v29 = vperm.slane %v1137_v35, %v3149_v4  ;;  %v3308_v15 = vperm.slane %v1161_v59, %v3149_v4  ;;  %v1072_v19 = vrot.slane %v1035_v62, 4 }
 0x265   : > { %v1013_v0 = vsel %vm676_vm8, %v1012_v31, %v773_v57  ;;  %v1025_v5 = vsel %vm676_vm8, %v1024_v42, %v3201_v14  ;;  %v3318_v39 = vperm.slane %v3238_v54, %v3149_v4  ;;  %v1084_v9 = vrot.slane %v3230_v44, 4 }
 0x266   : > { %v1096_v1 = vrot.slane %v1059_v2, 4  ;;  %v3312_v3 = vperm.slane %v1013_v0, %v3149_v4  ;;  %v1073_v6 = vsel %vm676_vm8, %v1072_v19, %v1023_v61  ;;  %v3322_v8 = vperm.slane %v1025_v5, %v3149_v4 }
 0x267   : > { %v945_v57 = vsel %vm676_vm8, %v944_v23, %v3247_v63  ;;  %v1074_v11 = vrot.slane %v1023_v61, 4  ;;  %v1079_v13 = vperm.slane %v1073_v6, %v3162_v27  ;;  %v1098_v14 = vrot.slane %v1047_v24, 4 }
 0x268   : > { %v1097_v18 = vsel %vm676_vm8, %v1096_v1, %v1047_v24  ;;  %v1060_v54 = vrot.slane %v3322_v8, 4  ;;  %v1085_v21 = vsel %vm676_vm8, %v1084_v9, %v3318_v39  ;;  %v3336_v63 = vsel %vm676_vm8, %v952_v51, %v3259_v10 }
 0x269   : > { %v1103_v20 = vperm.slane %v1097_v18, %v3162_v27  ;;  %v1118_v22 = vrot.slane %v1079_v13, 4  ;;  %v1091_v26 = vperm.slane %v1085_v21, %v3162_v27  ;;  %v1127_v28 = vsel %vm676_vm8, %v945_v57, %v1126_v25 }
 0x26a   : > { %v1061_v12 = vsel %vm676_vm8, %v1060_v54, %v3312_v3  ;;  %v1124_v16 = vrot.slane %v945_v57, 4  ;;  %v1139_v30 = vsel %vm676_vm8, %v947_v40, %v1138_v46  ;;  %v1135_v38 = vperm.slane %v1127_v28, %v3149_v4 }
 0x26b   : > { %v1116_v53 = vrot.slane %v1103_v20, 4  ;;  %v1119_v32 = vsel %vm676_vm8, %v1103_v20, %v1118_v22  ;;  %v1067_v33 = vperm.slane %v1061_v12, %v3162_v27  ;;  %v1108_v34 = vrot.slane %v1091_v26, 4 }
 0x26c   : > { %v1147_v36 = vperm.slane %v1139_v30, %v3149_v4  ;;  %v1354_v10 = vpack.c.bf16 %v1119_v32, %v1119_v32  ;;  %v1150_v41 = vrot.slane %v3281_v47, 4  ;;  %v1163_v40 = vsel %vm676_vm8, %v955_v45, %v1162_v17 }
 0x26d   : > { %v1117_v37 = vsel %vm676_vm8, %v1116_v53, %v1079_v13  ;;  %v1109_v42 = vsel %vm676_vm8, %v1108_v34, %v1067_v33  ;;  %v1110_v23 = vrot.slane %v1067_v33, 4  ;;  %v1148_v48 = vrot.slane %v3336_v63, 4 }
 0x26e   : > { %v1352_v31 = vpack.c.bf16 %v1117_v37, %v1117_v37  ;;  %v1411_v46 = vsel %vm1368_vm9, %v1354_v10, 0  ;;  %v1151_v49 = vsel %vm676_vm8, %v3336_v63, %v1150_v41  ;;  %v1171_v50 = vperm.slane %v1163_v40, %v3149_v4 }
 0x26f   : > { %1420 = vmatpush.bf16.xpose.msra.mxu3 %v1411_v46  ;;  %v1344_v52 = vpack.c.bf16 %v1109_v42, %v1109_v42  ;;  %v1159_v55 = vperm.slane %v1151_v49, %v3149_v4  ;;  %v1184_v56 = vrot.slane %v1147_v36, 4  ;;  %v1111_v35 = vsel %vm676_vm8, %v1091_v26, %v1110_v23 }
 0x270   : > { %v1373_v51 = vsel %vm1368_vm9, %v1352_v31, 0  ;;  %v1208_v45 = vrot.slane %v1171_v50, 4  ;;  %v1075_v59 = vsel %vm676_vm8, %v1035_v62, %v1074_v11  ;;  %v1099_v61 = vsel %vm676_vm8, %v1059_v2, %v1098_v14 }
 0x271   : > { %1382 = vmatpush.bf16.xpose.msra.mxu2 %v1373_v51  ;;  %v1185_v25 = vsel %vm676_vm8, %v1184_v56, %v1135_v38  ;;  %v1083_v17 = vperm.slane %v1075_v59, %v3162_v27  ;;  %v1107_v24 = vperm.slane %v1099_v61, %v3162_v27  ;;  %v1186_v19 = vrot.slane %v1135_v38, 4 }
 0x272   : > { %v1191_v0 = vperm.slane %v1185_v25, %v3162_v27  ;;  %v1209_v1 = vsel %vm676_vm8, %v1208_v45, %v1159_v55  ;;  %v1210_v5 = vrot.slane %v1159_v55, 4  ;;  %v1125_v6 = vsel %vm676_vm8, %v1124_v16, %v3277_v43 }
 0x273   : > { %v1215_v9 = vperm.slane %v1209_v1, %v3162_v27  ;;  %v1120_v62 = vrot.slane %v1107_v24, 4  ;;  %v1122_v57 = vrot.slane %v1083_v17, 4  ;;  %v1187_v2 = vsel %vm676_vm8, %v1147_v36, %v1186_v19 }
 0x274   : > { %v1346_v11 = vpack.c.bf16 %v1111_v35, %v1111_v35  ;;  %v1230_v13 = vrot.slane %v1191_v0, 4  ;;  %v1195_v18 = vperm.slane %v1187_v2, %v3162_v27  ;;  %v1211_v14 = vsel %vm676_vm8, %v1171_v50, %v1210_v5 }
 0x275   : > { %v1228_v20 = vrot.slane %v1215_v9, 4  ;;  %v1121_v54 = vsel %vm676_vm8, %v1120_v62, %v1083_v17  ;;  %v1123_v21 = vsel %vm676_vm8, %v1107_v24, %v1122_v57  ;;  %v1219_v22 = vperm.slane %v1211_v14, %v3162_v27 }
 0x276   : > { %2535 = vmatmul.msk.bf16.vlgmr.msra.gmra.mxu3 %vm1368_vm9, %v1346_v11  ;;  %v1231_v43 = vsel %vm676_vm8, %v1215_v9, %v1230_v13  ;;  %v1356_v26 = vpack.c.bf16 %v1121_v54, %v1121_v54  ;;  %v1358_v63 = vpack.c.bf16 %v1123_v21, %v1123_v21  ;;  %v1131_v28 = vperm.slane %v1125_v6, %v3149_v4 }
 0x277   : > { %v1229_v53 = vsel %vm676_vm8, %v1228_v20, %v1191_v0  ;;  %v1355_v12 = vpack.c.bf16 %v1231_v43, %v1231_v43  ;;  %v1232_v16 = vrot.slane %v1219_v22, 4  ;;  %v1149_v30 = vsel %vm676_vm8, %v1148_v48, %v3281_v47 }
 0x278   : > { %2533 = vmatmul.msk.bf16.vlgmr.msra.gmra.mxu2 %vm1368_vm9, %v1344_v52  ;;  %v1353_v32 = vpack.c.bf16 %v1229_v53, %v1229_v53  ;;  %v1155_v33 = vperm.slane %v1149_v30, %v3149_v4  ;;  %v1172_v37 = vrot.slane %v3305_v29, 4  ;;  %v1196_v10 = vrot.slane %v3308_v15, 4 }
 0x279   : > { %v1430_v34 = vsel %vm1368_vm9, %v1355_v12, 0  ;;  %v1233_v36 = vsel %vm676_vm8, %v1232_v16, %v1195_v18  ;;  %v1487_v41 = vsel %vm1368_vm9, %v1358_v63, 0  ;;  %v1174_v42 = vrot.slane %v1131_v28, 4 }
 0x27a   : > { %v1392_v38 = vsel %vm1368_vm9, %v1353_v32, 0  ;;  %1439 = vmatpush.bf16.xpose.msra.mxu1 %v1430_v34  ;;  %v1357_v31 = vpack.c.bf16 %v1233_v36, %v1233_v36  ;;  %v1449_v47 = vsel %vm1368_vm9, %v1356_v26, 0  ;;  %v1173_v23 = vsel %vm676_vm8, %v1172_v37, %v1131_v28 }
 0x27b   : > { %1401 = vmatpush.bf16.xpose.msrb.mxu2 %v1392_v38  ;;  %v1197_v40 = vsel %vm676_vm8, %v1196_v10, %v1155_v33  ;;  %v1198_v46 = vrot.slane %v1155_v33, 4  ;;  %v1234_v48 = vrot.slane %v1195_v18, 4  ;;  %v1179_v50 = vperm.slane %v1173_v23, %v3162_v27 }
 0x27c   : > { %v1468_v49 = vsel %vm1368_vm9, %v1357_v31, 0  ;;  %v1203_v51 = vperm.slane %v1197_v40, %v3162_v27  ;;  %v1175_v52 = vsel %vm676_vm8, %v3305_v29, %v1174_v42  ;;  %v1062_v59 = vrot.slane %v3312_v3, 4 }
 0x27d   : > { %1477 = vmatpush.bf16.xpose.msrb.mxu3 %v1468_v49  ;;  %v1199_v55 = vsel %vm676_vm8, %v3308_v15, %v1198_v46  ;;  %v1222_v35 = vrot.slane %v1179_v50, 4  ;;  %v1235_v25 = vsel %vm676_vm8, %v1219_v22, %v1234_v48  ;;  %v1183_v17 = vperm.slane %v1175_v52, %v3162_v27 }
 0x27e   : > { %v1220_v56 = vrot.slane %v1203_v51, 4  ;;  %v1207_v45 = vperm.slane %v1199_v55, %v3162_v27  ;;  %v1086_v15 = vrot.slane %v3318_v39, 4  ;;  %v1359_v1 = vpack.c.bf16 %v1235_v25, %v1235_v25 }
 0x27f   : > { %v1223_v61 = vsel %vm676_vm8, %v1203_v51, %v1222_v35  ;;  %v1063_v3 = vsel %vm676_vm8, %v3322_v8, %v1062_v59  ;;  %v1226_v20 = vrot.slane %v1183_v17, 4  ;;  %v2748_v46 = vpack.i.bf16 %v3136_v60, %v3131_v58 }
 0x280   : > { %v1224_v24 = vrot.slane %v1207_v45, 4  ;;  %v1347_v19 = vpack.c.bf16 %v1223_v61, %v1223_v61  ;;  %v1221_v0 = vsel %vm676_vm8, %v1220_v56, %v1179_v50  ;;  %v1071_v9 = vperm.slane %v1063_v3, %v3162_v27 }
 0x281   : > { %v1345_v6 = vpack.c.bf16 %v1221_v0, %v1221_v0  ;;  %v1506_v62 = vsel %vm1368_vm9, %v1359_v1, 0  ;;  %v1087_v57 = vsel %vm676_vm8, %v3230_v44, %v1086_v15  ;;  %v1227_v54 = vsel %vm676_vm8, %v1207_v45, %v1226_v20 }
 0x282   : > { %1496 = vmatpush.bf16.xpose.msrb.mxu1 %v1487_v41  ;;  %v1225_v29 = vsel %vm676_vm8, %v1224_v24, %v1183_v17  ;;  %v1095_v39 = vperm.slane %v1087_v57, %v3162_v27  ;;  %v1114_v2 = vrot.slane %v1071_v9, 4  ;;  %v1351_v21 = vpack.c.bf16 %v1227_v54, %v1227_v54 }
 0x283   : > { %1458 = vmatpush.bf16.xpose.msra.mxu2 %v1449_v47  ;;  %2536 = vmatmul.msk.bf16.vlgmr.msra.gmra.mxu1 %vm1368_vm9, %v1347_v19  ;;  %v1349_v5 = vpack.c.bf16 %v1225_v29, %v1225_v29 }
 0x284   : > { %v1112_v11 = vrot.slane %v1095_v39, 4  ;;  %v1115_v8 = vsel %vm676_vm8, %v1095_v39, %v1114_v2 }
 0x285   : > { %v1350_v13 = vpack.c.bf16 %v1115_v8, %v1115_v8 }
 0x286   : > { %2538 = vmatmul.msk.bf16.vlgmr.msrb.gmra.mxu3 %vm1368_vm9, %v1349_v5  ;;  %v1113_v18 = vsel %vm676_vm8, %v1112_v11, %v1071_v9 }
 0x287   : > { %v1348_v14 = vpack.c.bf16 %v1113_v18, %v1113_v18 }
 0x288   : > { %2534 = vmatmul.msk.bf16.vlgmr.msrb.gmra.mxu2 %vm1368_vm9, %v1345_v6 }
 0x28b   : > { %1515 = vmatpush.bf16.xpose.msrb.mxu2 %v1506_v62 }
 0x293   : > { %2539 = vmatmul.msk.bf16.vlgmr.msrb.gmra.mxu1 %vm1368_vm9, %v1350_v13 }
 0x298   : > { %2537 = vmatmul.msk.bf16.vlgmr.msra.gmra.mxu2 %vm1368_vm9, %v1348_v14 }
 0x2a8   : > { %2540 = vmatmul.msk.bf16.vlgmr.msrb.gmra.mxu2 %vm1368_vm9, %v1351_v21 }
 0x2f9   : > { %v1422_v44 = vpop.f32.mrf.mxu3 }
 0x2fa   : > { %v1523_v28 = vmul.f32 0.35355338, %v1422_v44 }
 0x2fb   : > { %v1384_v22 = vpop.f32.mrf.mxu2 }
 0x2fc   : > { %v1521_v43 = vmul.f32 0.35355338, %v1384_v22  ;;  %v1536_v32 = vsel %vm3113_vm0, %v1523_v28, -1e+09 }
 0x2fd   : > { %v1548_v36 = vsel %vm1368_vm9, %v1536_v32, -inf }
 0x2fe   : > { %v1534_v26 = vsel %vm3113_vm0, %v1521_v43, -1e+09 }
 0x2ff   : > { %v1542_v63 = vsel %vm1368_vm9, %v1534_v26, -inf }
 0x300   : > { %1543 = vmax.xlane.f32.xlu2 %v1542_v63  ;;  %v1441_v53 = vpop.f32.mrf.mxu1 }
 0x301   : > { %v1424_v12 = vpop.f32.mrf.mxu3  ;;  %v1524_v16 = vmul.f32 0.35355338, %v1441_v53 }
 0x303   : > { %v1386_v30 = vpop.f32.mrf.mxu2  ;;  %v1537_v33 = vsel %vm3113_vm0, %v1524_v16, -1e+09 }
 0x304   : > { %v1551_v34 = vsel %vm1368_vm9, %v1537_v33, -inf }
 0x305   : > { %1552 = vmax.xlane.f32.xlu0 %v1551_v34 }
 0x308   : > { %1549 = vmax.xlane.f32.xlu2 %v1548_v36  ;;  %v1443_v37 = vpop.f32.mrf.mxu1 }
 0x309   : > { %v1479_v10 = vpop.f32.mrf.mxu3 }
 0x30a   : > { %v1526_v60 = vmul.f32 0.35355338, %v1479_v10 }
 0x30b   : > { %v1403_v38 = vpop.f32.mrf.mxu2 }
 0x30c   : > { %v1522_v41 = vmul.f32 0.35355338, %v1403_v38  ;;  %v3444_v35 = vsel %vm3113_vm0, %v1526_v60, -1e+09 }
 0x30d   : > { %v1557_v61 = vsel %vm1368_vm9, %v3444_v35, -inf }
 0x30e   : > { %v1535_v31 = vsel %vm3113_vm0, %v1522_v41, -1e+09 }
 0x30f   : > { %v1545_v42 = vsel %vm1368_vm9, %v1535_v31, -inf }
 0x310   : > { %1546 = vmax.xlane.f32.xlu1 %v1545_v42  ;;  %v1498_v47 = vpop.f32.mrf.mxu1 }
 0x311   : > { %v1481_v23 = vpop.f32.mrf.mxu3  ;;  %v1527_v45 = vmul.f32 0.35355338, %v1498_v47 }
 0x313   : > { %v1405_v40 = vpop.f32.mrf.mxu2  ;;  %v3450_v25 = vsel %vm3113_vm0, %v1527_v45, -1e+09 }
 0x314   : > { %v1560_v24 = vsel %vm1368_vm9, %v3450_v25, -inf }
 0x318   : > { %v1500_v48 = vpop.f32.mrf.mxu1 }
 0x319   : > { %2749 = vrot.lane.b32.xlu0 %v2748_v46, %s2947_s23 }
 0x31b   : > { %v1460_v49 = vpop.f32.mrf.mxu2 }
 0x31c   : > { %v1525_v55 = vmul.f32 0.35355338, %v1460_v49 }
 0x31e   : > { %v3438_v56 = vsel %vm3113_vm0, %v1525_v55, -1e+09 }
 0x31f   : > { %v1554_v58 = vsel %vm1368_vm9, %v3438_v56, -inf }
 0x320   : > { %2744 = vrot.lane.b32.xlu2 %v2748_v46, %s2948_s16 }
 0x323   : > { %v1462_v50 = vpop.f32.mrf.mxu2 }
 0x328   : > { %2754 = vrot.lane.b32.xlu2 %v2748_v46, %s2949_s27 }
 0x329   : > { %2739 = vrot.lane.b32.xlu1 %v2748_v46, %s2950_s15 }
 0x32b   : > { %v1517_v51 = vpop.f32.mrf.mxu2 }
 0x32c   : > { %v1528_v59 = vmul.f32 0.35355338, %v1517_v51 }
 0x32e   : > { %v3454_v17 = vsel %vm3113_vm0, %v1528_v59, -1e+09 }
 0x32f   : > { %v1563_v19 = vsel %vm1368_vm9, %v3454_v17, -inf }
 0x333   : > { %v1519_v52 = vpop.f32.mrf.mxu2 }
 0x343   : > { %1555 = vmax.xlane.f32.xlu0 %v1554_v58 }
 0x34b   : > { %1558 = vmax.xlane.f32.xlu0 %v1557_v61 }
 0x351   : > { %1561 = vmax.xlane.f32.xlu2 %v1560_v24 }
 0x353   : > { %1564 = vmax.xlane.f32.xlu1 %v1563_v19 }
 0x373   : > { %v1544_v0 = vpop.xlane.xlu2 %1543 }
 0x374   : > { %v1566_v29 = vsub.f32 %v1534_v26, %v1544_v0 }
 0x376   : > { %v1574_v15 = vmul.f32 1.442695, %v1566_v29 }
 0x378   : > { %2779 = vpow2.f32 %v1574_v15  ;;  %v1553_v1 = vpop.xlane.xlu0 %1552 }
 0x379   : > { %v1569_v3 = vsub.f32 %v1537_v33, %v1553_v1 }
 0x37b   : > { %v1550_v5 = vpop.xlane.xlu2 %1549  ;;  %v1580_v9 = vmul.f32 1.442695, %v1569_v3 }
 0x37c   : > { %v1568_v6 = vsub.f32 %v1536_v32, %v1550_v5 }
 0x37d   : > { %2781 = vpow2.f32 %v1580_v9 }
 0x37e   : > { %v3460_v7 = vpop.eup %2779  ;;  %v1578_v62 = vmul.f32 1.442695, %v1568_v6 }
 0x37f   : > { %v1590_v57 = vsel %vm1368_vm9, %v3460_v7, 0.0 }
 0x380   : > { %2783 = vpow2.f32 %v1578_v62  ;;  %1591 = vadd.xlane.f32.xlu1 %v1590_v57 }
 0x383   : > { %v2745_v39 = vpop.permute.xlu2 %2744  ;;  %v1547_v2 = vpop.xlane.xlu1 %1546 }
 0x384   : > { %v3464_v11 = vpop.eup %2781  ;;  %v1567_v8 = vsub.f32 %v1535_v31, %v1547_v2  ;;  %v2747_v26 = vunpack.i.h.bf16 %v2745_v39  ;;  %v2746_v63 = vunpack.i.l.bf16 %v2745_v39 }
 0x385   : > { %v1599_v13 = vsel %vm1368_vm9, %v3464_v11, 0.0 }
 0x386   : > { %v3468_v18 = vpop.eup %2783  ;;  %v1576_v14 = vmul.f32 1.442695, %v1567_v8  ;;  %v970_v16 = vrot.slane %v2747_v26, 4  ;;  %v802_v32 = vrot.slane %v2746_v63, 4 }
 0x387   : > { %v1596_v20 = vsel %vm1368_vm9, %v3468_v18, 0.0 }
 0x388   : > { %2785 = vpow2.f32 %v1576_v14  ;;  %1597 = vadd.xlane.f32.xlu2 %v1596_v20  ;;  %1600 = vadd.xlane.f32.xlu1 %v1599_v13 }
 0x38b   : > { %v2755_v54 = vpop.permute.xlu2 %2754  ;;  %v2750_v53 = vpop.permute.xlu0 %2749 }
 0x38c   : > { %v2757_v44 = vunpack.i.h.bf16 %v2755_v54  ;;  %v2756_v43 = vunpack.i.l.bf16 %v2755_v54  ;;  %v2752_v30 = vunpack.i.h.bf16 %v2750_v53  ;;  %v2751_v36 = vunpack.i.l.bf16 %v2750_v53 }
 0x38e   : > { %v3472_v21 = vpop.eup %2785  ;;  %v968_v28 = vrot.slane %v2757_v44, 4  ;;  %v800_v12 = vrot.slane %v2756_v43, 4  ;;  %v971_v34 = vsel %vm676_vm8, %v2757_v44, %v970_v16  ;;  %v803_v10 = vsel %vm676_vm8, %v2756_v43, %v802_v32 }
 0x38f   : > { %v1593_v22 = vsel %vm1368_vm9, %v3472_v21, 0.0  ;;  %v979_v41 = vperm.slane %v971_v34, %v3149_v4  ;;  %v956_v31 = vrot.slane %v2752_v30, 4  ;;  %v788_v23 = vrot.slane %v2751_v36, 4 }
 0x390   : > { %1594 = vadd.xlane.f32.xlu0 %v1593_v22  ;;  %v969_v33 = vsel %vm676_vm8, %v968_v28, %v2747_v26  ;;  %v801_v37 = vsel %vm676_vm8, %v800_v12, %v2746_v63  ;;  %v811_v48 = vperm.slane %v803_v10, %v3149_v4 }
 0x391   : > { %v975_v38 = vperm.slane %v969_v33, %v3149_v4  ;;  %v807_v47 = vperm.slane %v801_v37, %v3149_v4  ;;  %v992_v59 = vrot.slane %v979_v41, 4 }
 0x392   : > { %v824_v1 = vrot.slane %v811_v48, 4 }
 0x393   : > { %v980_v55 = vrot.slane %v975_v38, 4  ;;  %v812_v45 = vrot.slane %v807_v47, 4 }
 0x39b   : > { %v2740_v42 = vpop.permute.xlu1 %2739 }
 0x39c   : > { %v2742_v40 = vunpack.i.h.bf16 %v2740_v42  ;;  %v2741_v46 = vunpack.i.l.bf16 %v2740_v42 }
 0x39e   : > { %v957_v49 = vsel %vm676_vm8, %v956_v31, %v2742_v40  ;;  %v958_v50 = vrot.slane %v2742_v40, 4  ;;  %v789_v51 = vsel %vm676_vm8, %v788_v23, %v2741_v46  ;;  %v790_v52 = vrot.slane %v2741_v46, 4 }
 0x39f   : > { %v963_v58 = vperm.slane %v957_v49, %v3149_v4  ;;  %v795_v60 = vperm.slane %v789_v51, %v3149_v4 }
 0x3a0   : > { %v959_v61 = vsel %vm676_vm8, %v2752_v30, %v958_v50  ;;  %v791_v24 = vsel %vm676_vm8, %v2751_v36, %v790_v52 }
 0x3a1   : > { %v967_v19 = vperm.slane %v959_v61, %v3149_v4  ;;  %v981_v0 = vsel %vm676_vm8, %v980_v55, %v963_v58  ;;  %v982_v29 = vrot.slane %v963_v58, 4  ;;  %v799_v15 = vperm.slane %v791_v24, %v3149_v4 }
 0x3a2   : > { %v987_v3 = vperm.slane %v981_v0, %v3162_v27  ;;  %v813_v5 = vsel %vm676_vm8, %v812_v45, %v795_v60  ;;  %v814_v6 = vrot.slane %v795_v60, 4 }
 0x3a3   : > { %v983_v9 = vsel %vm676_vm8, %v975_v38, %v982_v29  ;;  %v993_v62 = vsel %vm676_vm8, %v992_v59, %v967_v19  ;;  %v994_v57 = vrot.slane %v967_v19, 4  ;;  %v819_v39 = vperm.slane %v813_v5, %v3162_v27 }
 0x3a4   : > { %v991_v2 = vperm.slane %v983_v9, %v3162_v27  ;;  %v999_v8 = vperm.slane %v993_v62, %v3162_v27  ;;  %v1004_v13 = vrot.slane %v987_v3, 4  ;;  %v815_v14 = vsel %vm676_vm8, %v807_v47, %v814_v6 }
 0x3a5   : > { %v995_v20 = vsel %vm676_vm8, %v979_v41, %v994_v57  ;;  %v823_v54 = vperm.slane %v815_v14, %v3162_v27  ;;  %v825_v44 = vsel %vm676_vm8, %v824_v1, %v799_v15  ;;  %v826_v22 = vrot.slane %v799_v15, 4 }
 0x3a6   : > { %v1003_v43 = vperm.slane %v995_v20, %v3162_v27  ;;  %v1005_v26 = vsel %vm676_vm8, 0.0, %v1004_v13  ;;  %v1006_v63 = vrot.slane %v991_v2, 4  ;;  %v1008_v28 = vrot.slane %v999_v8, 4 }
 0x3a7   : > { %v827_v53 = vsel %vm676_vm8, %v811_v48, %v826_v22  ;;  %v831_v12 = vperm.slane %v825_v44, %v3162_v27  ;;  %v836_v16 = vrot.slane %v819_v39, 4  ;;  %v838_v30 = vrot.slane %v823_v54, 4 }
 0x3a8   : > { %v1007_v32 = vsel %vm676_vm8, 0.0, %v1006_v63  ;;  %v1009_v33 = vsel %vm676_vm8, 0.0, %v1008_v28  ;;  %v1010_v34 = vrot.slane %v1003_v43, 4  ;;  %v1290_v36 = vsel %vm676_vm8, %v1006_v63, %v987_v3 }
 0x3a9   : > { %v1295_v37 = vrot.slane %v1007_v32, 4  ;;  %v835_v10 = vperm.slane %v827_v53, %v3162_v27  ;;  %v837_v38 = vsel %vm676_vm8, 0.0, %v836_v16  ;;  %v839_v41 = vsel %vm676_vm8, 0.0, %v838_v30 }
 0x3aa   : > { %v1011_v31 = vsel %vm676_vm8, 0.0, %v1010_v34  ;;  %v840_v42 = vrot.slane %v831_v12, 4  ;;  %v1236_v47 = vsel %vm676_vm8, %v838_v30, %v819_v39  ;;  %v1241_v23 = vrot.slane %v839_v41, 4 }
 0x3ab   : > { %v1296_v40 = vsel %vm676_vm8, %v1295_v37, %v1005_v26  ;;  %v1306_v46 = vrot.slane %v1011_v31, 4  ;;  %v842_v48 = vrot.slane %v835_v10, 4  ;;  %v1240_v49 = vperm.slane %v1236_v47, %v3149_v4 }
 0x3ac   : > { %v841_v50 = vsel %vm676_vm8, 0.0, %v840_v42  ;;  %v1242_v51 = vsel %vm676_vm8, %v1241_v23, %v837_v38  ;;  %v1294_v52 = vperm.slane %v1290_v36, %v3149_v4  ;;  %v1300_v55 = vperm.slane %v1296_v40, %v3149_v4 }
 0x3ad   : > { %v843_v58 = vsel %vm676_vm8, 0.0, %v842_v48  ;;  %v1246_v60 = vperm.slane %v1242_v51, %v3149_v4  ;;  %v1247_v45 = vsel %vm676_vm8, %v842_v48, %v831_v12  ;;  %v1301_v59 = vsel %vm676_vm8, %v1010_v34, %v999_v8 }
 0x3ae   : > { %v1252_v61 = vrot.slane %v843_v58, 4  ;;  %v1251_v24 = vperm.slane %v1247_v45, %v3149_v4  ;;  %v1305_v19 = vperm.slane %v1301_v59, %v3149_v4  ;;  %v1307_v0 = vsel %vm676_vm8, %v1306_v46, %v1009_v33 }
 0x3af   : > { %v1258_v29 = vrot.slane %v1246_v60, 4  ;;  %v1311_v15 = vperm.slane %v1307_v0, %v3149_v4  ;;  %v1312_v1 = vrot.slane %v1300_v55, 4  ;;  %v1314_v3 = vrot.slane %v1294_v52, 4 }
 0x3b0   : > { %v1253_v5 = vsel %vm676_vm8, %v1252_v61, %v841_v50  ;;  %v1326_v6 = vrot.slane %v1305_v19, 4  ;;  %v1260_v9 = vrot.slane %v1240_v49, 4  ;;  %v1272_v62 = vrot.slane %v1251_v24, 4 }
 0x3b1   : > { %v1257_v57 = vperm.slane %v1253_v5, %v3149_v4  ;;  %v1259_v39 = vsel %vm676_vm8, %v1258_v29, %v1240_v49  ;;  %v1313_v2 = vsel %vm676_vm8, %v1312_v1, %v1294_v52  ;;  %v1324_v8 = vrot.slane %v1311_v15, 4 }
 0x3b2   : > { %v1265_v13 = vperm.slane %v1259_v39, %v3162_v27  ;;  %v1319_v14 = vperm.slane %v1313_v2, %v3162_v27  ;;  %v1315_v20 = vsel %vm676_vm8, %v1300_v55, %v1314_v3  ;;  %v1327_v54 = vsel %vm676_vm8, %v1311_v15, %v1326_v6 }
 0x3b3   : > { %v1270_v44 = vrot.slane %v1257_v57, 4  ;;  %v1325_v22 = vsel %vm676_vm8, %v1324_v8, %v1305_v19  ;;  %v1323_v43 = vperm.slane %v1315_v20, %v3162_v27  ;;  %v1335_v26 = vperm.slane %v1327_v54, %v3162_v27 }
 0x3b4   : > { %v1284_v63 = vrot.slane %v1265_v13, 4  ;;  %v1331_v28 = vperm.slane %v1325_v22, %v3162_v27  ;;  %v1338_v53 = vrot.slane %v1319_v14, 4  ;;  %v1261_v12 = vsel %vm676_vm8, %v1246_v60, %v1260_v9 }
 0x3b5   : > { %v1271_v16 = vsel %vm676_vm8, %v1270_v44, %v1251_v24  ;;  %v1340_v30 = vrot.slane %v1335_v26, 4  ;;  %v1342_v32 = vrot.slane %v1323_v43, 4  ;;  %v1269_v33 = vperm.slane %v1261_v12, %v3162_v27 }
 0x3b6   : > { %v1277_v34 = vperm.slane %v1271_v16, %v3162_v27  ;;  %v1339_v36 = vsel %vm676_vm8, %v1331_v28, %v1338_v53  ;;  %v1273_v37 = vsel %vm676_vm8, %v1257_v57, %v1272_v62  ;;  %v1336_v10 = vrot.slane %v1331_v28, 4  ;;  %v1556_v47 = vpop.xlane.xlu0 %1555 }
 0x3b7   : > { %v1363_v38 = vpack.c.bf16 %v1339_v36, %v1339_v36  ;;  %v1341_v41 = vsel %vm676_vm8, %v1340_v30, %v1323_v43  ;;  %v1281_v31 = vperm.slane %v1273_v37, %v3162_v27  ;;  %v1288_v42 = vrot.slane %v1269_v33, 4 }
 0x3b8   : > { %v1285_v23 = vsel %vm676_vm8, %v1277_v34, %v1284_v63  ;;  %v1365_v40 = vpack.c.bf16 %v1341_v41, %v1341_v41  ;;  %v1343_v46 = vsel %vm676_vm8, %v1335_v26, %v1342_v32  ;;  %v1282_v48 = vrot.slane %v1277_v34, 4 }
 0x3b9   : > { %v1362_v49 = vpack.c.bf16 %v1285_v23, %v1285_v23  ;;  %v1700_v50 = vsel %vm1641_vm10, %v1363_v38, 0  ;;  %v1289_v51 = vsel %vm676_vm8, %v1281_v31, %v1288_v42  ;;  %v1367_v52 = vpack.c.bf16 %v1343_v46, %v1343_v46 }
 0x3ba   : > { %1709 = vmatpush.bf16.msra.mxu2 %v1700_v50  ;;  %v1738_v55 = vsel %vm1641_vm10, %v1365_v40, 0  ;;  %v1366_v58 = vpack.c.bf16 %v1289_v51, %v1289_v51  ;;  %v1283_v60 = vsel %vm676_vm8, %v1282_v48, %v1265_v13  ;;  %v1570_v45 = vsub.f32 %v3438_v56, %v1556_v47 }
 0x3bb   : > { %v1681_v59 = vsel %vm1641_vm10, %v1362_v49, 0  ;;  %1747 = vmatpush.bf16.msrb.mxu0 %v1738_v55  ;;  %v1776_v61 = vsel %vm1641_vm10, %v1367_v52, 0  ;;  %v1360_v24 = vpack.c.bf16 %v1283_v60, %v1283_v60  ;;  %v1337_v19 = vsel %vm676_vm8, %v1336_v10, %v1319_v14 }
 0x3bc   : > { %1690 = vmatpush.bf16.msra.mxu1 %v1681_v59  ;;  %v1757_v0 = vsel %vm1641_vm10, %v1366_v58, 0  ;;  %v1582_v29 = vmul.f32 1.442695, %v1570_v45  ;;  %v1361_v15 = vpack.c.bf16 %v1337_v19, %v1337_v19  ;;  %v1286_v1 = vrot.slane %v1281_v31, 4 }
 0x3bd   : > { %v1643_v3 = vsel %vm1641_vm10, %v1360_v24, 0 }
 0x3be   : > { %1785 = vmatpush.bf16.msrb.mxu2 %v1776_v61  ;;  %1652 = vmatpush.bf16.msra.mxu3 %v1643_v3  ;;  %2787 = vpow2.f32 %v1582_v29  ;;  %v1662_v56 = vsel %vm1641_vm10, %v1361_v15, 0  ;;  %v1287_v5 = vsel %vm676_vm8, %v1286_v1, %v1269_v33  ;;  %v1559_v6 = vpop.xlane.xlu0 %1558 }
 0x3bf   : > { %v1364_v9 = vpack.c.bf16 %v1287_v5, %v1287_v5  ;;  %v1571_v62 = vsub.f32 %v3444_v35, %v1559_v6 }
 0x3c0   : > { %1766 = vmatpush.bf16.msrb.mxu1 %v1757_v0 }
 0x3c1   : > { %v1719_v57 = vsel %vm1641_vm10, %v1364_v9, 0  ;;  %v1584_v39 = vmul.f32 1.442695, %v1571_v62 }
 0x3c2   : > { %1671 = vmatpush.bf16.msrb.mxu3 %v1662_v56 }
 0x3c3   : > { %2789 = vpow2.f32 %v1584_v39 }
 0x3c4   : > { %v2788_v2 = vpop.eup %2787  ;;  %v1562_v8 = vpop.xlane.xlu2 %1561 }
 0x3c5   : > { %v1572_v13 = vsub.f32 %v3450_v25, %v1562_v8  ;;  %v1602_v14 = vsel %vm1368_vm9, %v2788_v2, 0.0 }
 0x3c6   : > { %v1565_v20 = vpop.xlane.xlu1 %1564  ;;  %1603 = vadd.xlane.f32.xlu0 %v1602_v14 }
 0x3c7   : > { %v1586_v54 = vmul.f32 1.442695, %v1572_v13  ;;  %v1573_v44 = vsub.f32 %v3454_v17, %v1565_v20 }
 0x3c9   : > { %2791 = vpow2.f32 %v1586_v54  ;;  %v1588_v22 = vmul.f32 1.442695, %v1573_v44  ;;  %v2790_v43 = vpop.eup %2789 }
 0x3ca   : > { %v1605_v35 = vsel %vm1368_vm9, %v2790_v43, 0.0 }
 0x3cb   : > { %2793 = vpow2.f32 %v1588_v22  ;;  %1606 = vadd.xlane.f32.xlu2 %v1605_v35 }
 0x3cf   : > { %v2792_v26 = vpop.eup %2791 }
 0x3d0   : > { %v1608_v63 = vsel %vm1368_vm9, %v2792_v26, 0.0 }
 0x3d1   : > { %v2794_v28 = vpop.eup %2793  ;;  %1609 = vadd.xlane.f32.xlu0 %v1608_v63 }
 0x3d2   : > { %v1611_v25 = vsel %vm1368_vm9, %v2794_v28, 0.0 }
 0x3d3   : > { %1612 = vadd.xlane.f32.xlu1 %v1611_v25 }
 0x3f3   : > { %v1592_v53 = vpop.xlane.xlu1 %1591 }
 0x3f4   : > { %2795 = vrcp.f32 %v1592_v53 }
 0x3fa   : > { %v2796_v12 = vpop.eup %2795 }
 0x3fb   : > { %v1622_v17 = vmul.f32 %v2796_v12, %v3460_v7  ;;  %v1598_v16 = vpop.xlane.xlu2 %1597  ;;  %v1601_v30 = vpop.xlane.xlu1 %1600 }
 0x3fc   : > { %2797 = vrcp.f32 %v1598_v16 }
 0x3fd   : > { %v1630_v32 = vpack.c.bf16 %v1622_v17, %v1622_v17  ;;  %2799 = vrcp.f32 %v1601_v30 }
 0x3ff   : > { %2541 = vmatmul.msk.bf16.vlgmr.msra.gmra.mxu3 %vm1368_vm9, %v1630_v32 }
 0x400   : > { %1728 = vmatpush.bf16.msra.mxu3 %v1719_v57 }
 0x402   : > { %v2798_v33 = vpop.eup %2797 }
 0x403   : > { %v2800_v34 = vpop.eup %2799  ;;  %v1624_v36 = vmul.f32 %v2798_v33, %v3468_v18  ;;  %v1595_v10 = vpop.xlane.xlu0 %1594 }
 0x404   : > { %v1625_v37 = vmul.f32 %v2800_v34, %v3464_v11  ;;  %2801 = vrcp.f32 %v1595_v10 }
 0x405   : > { %v1632_v38 = vpack.c.bf16 %v1624_v36, %v1624_v36 }
 0x406   : > { %v1633_v41 = vpack.c.bf16 %v1625_v37, %v1625_v37 }
 0x407   : > { %2543 = vmatmul.msk.bf16.vlgmr.msra.gmra.mxu1 %vm1368_vm9, %v1632_v38 }
 0x408   : > { %2544 = vmatmul.msk.bf16.vlgmr.msra.gmra.mxu2 %vm1368_vm9, %v1633_v41 }
 0x40a   : > { %v2802_v7 = vpop.eup %2801 }
 0x40b   : > { %v1623_v31 = vmul.f32 %v2802_v7, %v3472_v21 }
 0x40d   : > { %v1631_v42 = vpack.c.bf16 %v1623_v31, %v1623_v31 }
 0x40f   : > { %2542 = vmatmul.msk.bf16.vlgmr.msrb.gmra.mxu3 %vm1368_vm9, %v1631_v42 }
 0x439   : > { %v1604_v47 = vpop.xlane.xlu0 %1603 }
 0x43a   : > { %2803 = vrcp.f32 %v1604_v47 }
 0x43e   : > { %v1607_v23 = vpop.xlane.xlu2 %1606 }
 0x43f   : > { %2805 = vrcp.f32 %v1607_v23 }
 0x440   : > { %v2804_v18 = vpop.eup %2803 }
 0x441   : > { %v1626_v11 = vmul.f32 %v2804_v18, %v2788_v2 }
 0x443   : > { %v1634_v40 = vpack.c.bf16 %v1626_v11, %v1626_v11 }
 0x444   : > { %v1610_v46 = vpop.xlane.xlu0 %1609 }
 0x445   : > { %2807 = vrcp.f32 %v1610_v46  ;;  %2545 = vmatmul.msk.bf16.vlgmr.msra.gmra.mxu3 %vm1368_vm9, %v1634_v40  ;;  %v2806_v48 = vpop.eup %2805 }
 0x446   : > { %v1613_v49 = vpop.xlane.xlu1 %1612  ;;  %v1627_v50 = vmul.f32 %v2806_v48, %v2790_v43 }
 0x447   : > { %2809 = vrcp.f32 %v1613_v49 }
 0x448   : > { %v1635_v51 = vpack.c.bf16 %v1627_v50, %v1627_v50 }
 0x44a   : > { %2546 = vmatmul.msk.bf16.vlgmr.msrb.gmra.mxu0 %vm1368_vm9, %v1635_v51 }
 0x44b   : > { %v2808_v21 = vpop.eup %2807 }
 0x44c   : > { %v1628_v52 = vmul.f32 %v2808_v21, %v2792_v26 }
 0x44d   : > { %v2810_v55 = vpop.eup %2809 }
 0x44e   : > { %v1636_v58 = vpack.c.bf16 %v1628_v52, %v1628_v52  ;;  %v1629_v60 = vmul.f32 %v2810_v55, %v2794_v28 }
 0x450   : > { %v1637_v45 = vpack.c.bf16 %v1629_v60, %v1629_v60  ;;  %2547 = vmatmul.msk.bf16.vlgmr.msrb.gmra.mxu1 %vm1368_vm9, %v1636_v58 }
 0x452   : > { %2548 = vmatmul.msk.bf16.vlgmr.msrb.gmra.mxu2 %vm1368_vm9, %v1637_v45 }
 0x482   : > { %v1654_v59 = vpop.f32.mrf.mxu3 }
 0x483   : > { %v1793_v3 = vrot.slane %v1654_v59, 4 }
 0x484   : > { %v1692_v61 = vpop.f32.mrf.mxu1 }
 0x485   : > { %v1805_v8 = vrot.slane %v1692_v61, 4 }
 0x48a   : > { %v1656_v24 = vpop.f32.mrf.mxu3 }
 0x48b   : > { %v1711_v19 = vpop.f32.mrf.mxu2 }
 0x48c   : > { %v1694_v0 = vpop.f32.mrf.mxu1  ;;  %v1861_v41 = vrot.slane %v1711_v19, 4 }
 0x492   : > { %v1673_v29 = vpop.f32.mrf.mxu3 }
 0x493   : > { %v1713_v15 = vpop.f32.mrf.mxu2  ;;  %v1849_v39 = vrot.slane %v1673_v29, 4 }
 0x49a   : > { %v1675_v1 = vpop.f32.mrf.mxu3 }
 0x4c7   : > { %v1749_v5 = vpop.f32.mrf.mxu0 }
 0x4c8   : > { %v1730_v56 = vpop.f32.mrf.mxu3  ;;  %v1847_v57 = vrot.slane %v1749_v5, 4  ;;  %v1850_v20 = vsel %vm676_vm8, %v1749_v5, %v1849_v39 }
 0x4c9   : > { %v1791_v6 = vrot.slane %v1730_v56, 4  ;;  %v1794_v9 = vsel %vm676_vm8, %v1730_v56, %v1793_v3  ;;  %v1858_v63 = vperm.slane %v1850_v20, %v3149_v4 }
 0x4ca   : > { %v1802_v62 = vperm.slane %v1794_v9, %v3149_v4  ;;  %v1848_v44 = vsel %vm676_vm8, %v1847_v57, %v1673_v29 }
 0x4cb   : > { %v1792_v2 = vsel %vm676_vm8, %v1791_v6, %v1654_v59  ;;  %v1854_v12 = vperm.slane %v1848_v44, %v3149_v4  ;;  %v1885_v31 = vrot.slane %v1858_v63, 4 }
 0x4cc   : > { %v1798_v13 = vperm.slane %v1792_v2, %v3149_v4  ;;  %v1829_v14 = vrot.slane %v1802_v62, 4 }
 0x4cd   : > { %v1768_v54 = vpop.f32.mrf.mxu1  ;;  %v1873_v7 = vrot.slane %v1854_v12, 4 }
 0x4ce   : > { %v1803_v22 = vrot.slane %v1768_v54, 4  ;;  %v1806_v43 = vsel %vm676_vm8, %v1768_v54, %v1805_v8  ;;  %v1817_v35 = vrot.slane %v1798_v13, 4 }
 0x4cf   : > { %v1814_v26 = vperm.slane %v1806_v43, %v3149_v4  ;;  %v1751_v53 = vpop.f32.mrf.mxu0 }
 0x4d0   : > { %v1804_v28 = vsel %vm676_vm8, %v1803_v22, %v1692_v61  ;;  %v1732_v25 = vpop.f32.mrf.mxu3 }
 0x4d1   : > { %v1810_v17 = vperm.slane %v1804_v28, %v3149_v4  ;;  %v1827_v16 = vrot.slane %v1814_v26, 4  ;;  %v1830_v30 = vsel %vm676_vm8, %v1814_v26, %v1829_v14 }
 0x4d2   : > { %v1838_v32 = vperm.slane %v1830_v30, %v3162_v27 }
 0x4d3   : > { %v1815_v33 = vrot.slane %v1810_v17, 4  ;;  %v1818_v34 = vsel %vm676_vm8, %v1810_v17, %v1817_v35  ;;  %v1828_v36 = vsel %vm676_vm8, %v1827_v16, %v1802_v62 }
 0x4d4   : > { %v1826_v37 = vperm.slane %v1818_v34, %v3162_v27  ;;  %v1834_v10 = vperm.slane %v1828_v36, %v3162_v27  ;;  %v1845_v38 = vrot.slane %v1838_v32, 4 }
 0x4d5   : > { %v1816_v42 = vsel %vm676_vm8, %v1815_v33, %v1798_v13  ;;  %v1770_v47 = vpop.f32.mrf.mxu1  ;;  %v1787_v23 = vpop.f32.mrf.mxu2 }
 0x4d6   : > { %v1822_v18 = vperm.slane %v1816_v42, %v3162_v27  ;;  %v1841_v11 = vrot.slane %v1826_v37, 4  ;;  %v1843_v40 = vrot.slane %v1834_v10, 4  ;;  %v1846_v46 = vsel %vm676_vm8, 0.0, %v1845_v38 }
 0x4d7   : > { %v1914_v48 = vsel %vm676_vm8, %v1845_v38, %v1834_v10  ;;  %v1919_v49 = vrot.slane %v1846_v46, 4  ;;  %v1859_v50 = vrot.slane %v1787_v23, 4  ;;  %v1862_v51 = vsel %vm676_vm8, %v1787_v23, %v1861_v41 }
 0x4d8   : > { %v1839_v21 = vrot.slane %v1822_v18, 4  ;;  %v1842_v52 = vsel %vm676_vm8, 0.0, %v1841_v11  ;;  %v1844_v55 = vsel %vm676_vm8, 0.0, %v1843_v40  ;;  %v1903_v58 = vsel %vm676_vm8, %v1841_v11, %v1822_v18 }
 0x4d9   : > { %v1908_v60 = vrot.slane %v1842_v52, 4  ;;  %v1918_v45 = vperm.slane %v1914_v48, %v3149_v4  ;;  %v1920_v59 = vsel %vm676_vm8, %v1919_v49, %v1844_v55  ;;  %v1860_v61 = vsel %vm676_vm8, %v1859_v50, %v1711_v19 }
 0x4da   : > { %v1924_v24 = vperm.slane %v1920_v59, %v3149_v4  ;;  %v1866_v0 = vperm.slane %v1860_v61, %v3149_v4  ;;  %v1870_v29 = vperm.slane %v1862_v51, %v3149_v4  ;;  %v1840_v15 = vsel %vm676_vm8, 0.0, %v1839_v21 }
 0x4db   : > { %v1939_v1 = vrot.slane %v1918_v45, 4  ;;  %v1907_v3 = vperm.slane %v1903_v58, %v3149_v4  ;;  %v1909_v56 = vsel %vm676_vm8, %v1908_v60, %v1840_v15 }
 0x4dc   : > { %v1871_v5 = vrot.slane %v1866_v0, 4  ;;  %v1874_v6 = vsel %vm676_vm8, %v1866_v0, %v1873_v7  ;;  %v1883_v9 = vrot.slane %v1870_v29, 4  ;;  %v1886_v62 = vsel %vm676_vm8, %v1870_v29, %v1885_v31 }
 0x4dd   : > { %v1882_v19 = vperm.slane %v1874_v6, %v3162_v27  ;;  %v1894_v57 = vperm.slane %v1886_v62, %v3162_v27  ;;  %v1789_v39 = vpop.f32.mrf.mxu2  ;;  %v1913_v2 = vperm.slane %v1909_v56, %v3149_v4  ;;  %v1927_v8 = vrot.slane %v1907_v3, 4 }
 0x4de   : > { %v1872_v13 = vsel %vm676_vm8, %v1871_v5, %v1854_v12  ;;  %v1884_v14 = vsel %vm676_vm8, %v1883_v9, %v1858_v63  ;;  %v1940_v20 = vsel %vm676_vm8, %v1924_v24, %v1939_v1  ;;  %v1937_v54 = vrot.slane %v1924_v24, 4 }
 0x4df   : > { %v1878_v44 = vperm.slane %v1872_v13, %v3162_v27  ;;  %v1890_v22 = vperm.slane %v1884_v14, %v3162_v27  ;;  %v1897_v43 = vrot.slane %v1882_v19, 4  ;;  %v1901_v35 = vrot.slane %v1894_v57, 4  ;;  %v2638_v13 = vld [vmem:[%s3095_s12] sm:$0xff]  ;;  %v2647_v14 = vld [vmem:[%s3100_s18 + $0x38] sm:$0xff] }
 0x4e0   : > { %v1928_v26 = vsel %vm676_vm8, %v1913_v2, %v1927_v8  ;;  %v1948_v28 = vperm.slane %v1940_v20, %v3162_v27  ;;  %v1925_v25 = vrot.slane %v1913_v2, 4  ;;  %v1938_v10 = vsel %vm676_vm8, %v1937_v54, %v1918_v45  ;;  %v2639_v8 = vld [vmem:[%s3095_s12 + $0x8] sm:$0xff]  ;;  %2150 = vmatpush.bf16.msra.mxu0 %v2647_v14  ;;  %v2646_v20 = vld [vmem:[%s3100_s18 + $0x30] sm:$0xff] }
 0x4e1   : > { %v1895_v53 = vrot.slane %v1878_v44, 4  ;;  %v1898_v17 = vsel %vm676_vm8, 0.0, %v1897_v43  ;;  %v1899_v12 = vrot.slane %v1890_v22, 4  ;;  %v1902_v63 = vsel %vm676_vm8, 0.0, %v1901_v35  ;;  %2071 = vmatpush.bf16.msrb.mxu3 %v2639_v8  ;;  %v2645_v54 = vld [vmem:[%s3100_s18 + $0x28] sm:$0xff] }
 0x4e2   : > { %v1957_v16 = vsel %vm676_vm8, %v1897_v43, %v1878_v44  ;;  %v1962_v30 = vrot.slane %v1898_v17, 4  ;;  %v1968_v32 = vsel %vm676_vm8, %v1901_v35, %v1890_v22  ;;  %v1973_v33 = vrot.slane %v1902_v63, 4  ;;  %v2644_v44 = vld [vmem:[%s3100_s18 + $0x20] sm:$0xff] }
 0x4e3   : > { %v1900_v34 = vsel %vm676_vm8, 0.0, %v1899_v12  ;;  %v1972_v36 = vperm.slane %v1968_v32, %v3149_v4  ;;  %v1896_v37 = vsel %vm676_vm8, 0.0, %v1895_v53  ;;  %v1961_v41 = vperm.slane %v1957_v16, %v3149_v4 }
 0x4e4   : > { %v1974_v38 = vsel %vm676_vm8, %v1973_v33, %v1900_v34  ;;  %v1963_v7 = vsel %vm676_vm8, %v1962_v30, %v1896_v37  ;;  %v1936_v47 = vperm.slane %v1928_v26, %v3162_v27  ;;  %v1926_v11 = vsel %vm676_vm8, %v1925_v25, %v1907_v3  ;;  %2151 = vmatpush.bf16.msra.mxu0 %v2646_v20  ;;  %v2643_v37 = vld [vmem:[%s3100_s18 + $0x18] sm:$0xff] }
 0x4e5   : > { %v1978_v31 = vperm.slane %v1974_v38, %v3149_v4  ;;  %v1993_v42 = vrot.slane %v1972_v36, 4  ;;  %v1967_v23 = vperm.slane %v1963_v7, %v3149_v4  ;;  %v1981_v18 = vrot.slane %v1961_v41, 4  ;;  %2072 = vmatpush.bf16.msrb.mxu3 %v2638_v13  ;;  %v2641_v38 = vld [vmem:[%s3100_s18 + $0x8] sm:$0xff] }
 0x4e6   : > { %v1944_v40 = vperm.slane %v1938_v10, %v3162_v27  ;;  %v1953_v46 = vrot.slane %v1948_v28, 4  ;;  %v1932_v49 = vperm.slane %v1926_v11, %v3162_v27  ;;  %v1955_v4 = vrot.slane %v1936_v47, 4  ;;  %v2642_v10 = vld [vmem:[%s3100_s18 + $0x10] sm:$0xff]  ;;  %v2820_v11 = vld [vmem:[#allocation5] sm:$0xff] }
 0x4e7   : > { %v1994_v48 = vsel %vm676_vm8, %v1978_v31, %v1993_v42  ;;  %v1979_v50 = vrot.slane %v1967_v23, 4  ;;  %v1982_v51 = vsel %vm676_vm8, %v1967_v23, %v1981_v18  ;;  %v1991_v55 = vrot.slane %v1978_v31, 4  ;;  %v3678_v31 = vld [vmem:[%s3080_s24] sm:$0xf] }
 0x4e8   : > { %v2002_v21 = vperm.slane %v1994_v48, %v3162_v27  ;;  %v1949_v52 = vrot.slane %v1944_v40, 4  ;;  %v1990_v58 = vperm.slane %v1982_v51, %v3162_v27  ;;  %v1951_v60 = vrot.slane %v1932_v49, 4  ;;  %2152 = vmatpush.bf16.msra.mxu0 %v2645_v54 }
 0x4e9   : > { %v1980_v45 = vsel %vm676_vm8, %v1979_v50, %v1961_v41  ;;  %v1992_v24 = vsel %vm676_vm8, %v1991_v55, %v1972_v36  ;;  %v1954_v1 = vsel %vm676_vm8, %v1953_v46, %v1936_v47  ;;  %v1956_v6 = vsel %vm676_vm8, %v1948_v28, %v1955_v4  ;;  %v2640_v41 = vld [vmem:[%s3100_s18] sm:$0xff]  ;;  %v2821_v46 = vld [vmem:[#allocation5 + $0x8] sm:$0xff] }
 0x4ea   : > { %v2007_v59 = vrot.slane %v2002_v21, 4  ;;  %v1986_v61 = vperm.slane %v1980_v45, %v3162_v27  ;;  %v1950_v0 = vsel %vm676_vm8, %v1949_v52, %v1932_v49  ;;  %v2009_v29 = vrot.slane %v1990_v58, 4  ;;  %v2774_v50 = vld [vmem:[%s457_s25] ss:$0 sm:$0xff] }
 0x4eb   : > { %v1998_v15 = vperm.slane %v1992_v24, %v3162_v27  ;;  %v1952_v57 = vsel %vm676_vm8, %v1944_v40, %v1951_v60  ;;  %v2048_v42 = vperm.slane %v3678_v31, 2 }
 0x4ec   : > { %v2008_v3 = vsel %vm676_vm8, %v2007_v59, %v1990_v58  ;;  %v2005_v56 = vrot.slane %v1986_v61, 4  ;;  %v2010_v9 = vsel %vm676_vm8, %v2002_v21, %v2009_v29  ;;  %2153 = vmatpush.bf16.msra.mxu0 %v2644_v44  ;;  %v2653_v44 = vld [vmem:[%s3065_s22 + $0x28] sm:$0xff] }
 0x4ed   : > { %v2763_v5 = vpack.i.bf16 %v2008_v3, %v1954_v1  ;;  %v2003_v62 = vrot.slane %v1998_v15, 4  ;;  %v2768_v19 = vpack.i.bf16 %v2010_v9, %v1956_v6  ;;  %v2655_v6 = vld [vmem:[%s3065_s22 + $0x38] sm:$0xff] }
 0x4ee   : > { %v2006_v27 = vsel %vm676_vm8, %v1998_v15, %v2005_v56  ;;  %2310 = vmatpush.bf16.msra.mxu1 %v2655_v6 }
 0x4ef   : > { %2764 = vrot.lane.b32.xlu2 %v2763_v5, %s2951_s7  ;;  %v2758_v39 = vpack.i.bf16 %v2006_v27, %v1952_v57  ;;  %v2004_v2 = vsel %vm676_vm8, %v2003_v62, %v1986_v61  ;;  %2769 = vrot.lane.b32.xlu0 %v2768_v19, %s2952_s30  ;;  %v2654_v27 = vld [vmem:[%s3065_s22 + $0x30] sm:$0xff] }
 0x4f0   : > { %2154 = vmatpush.bf16.msra.mxu0 %v2643_v37 }
 0x4f1   : > { %2759 = vrot.lane.b32.xlu1 %v2758_v39, %s2953_s9 }
 0x4f2   : > { %2311 = vmatpush.bf16.msra.mxu1 %v2654_v27 }
 0x4f4   : > { %2155 = vmatpush.bf16.msra.mxu0 %v2642_v10 }
 0x4f6   : > { %2312 = vmatpush.bf16.msra.mxu1 %v2653_v44 }
 0x4f8   : > { %2156 = vmatpush.bf16.msra.mxu0 %v2641_v38 }
 0x4fc   : > { %2157 = vmatpush.bf16.msra.mxu0 %v2640_v41  ;;  %v2650_v41 = vld [vmem:[%s3065_s22 + $0x10] sm:$0xff] }
 0x549   : > { %v2765_v22 = vpop.permute.xlu2 %2764 }
 0x54a   : > { %v2767_v25 = vunpack.i.h.bf16 %v2765_v22  ;;  %v2766_v53 = vunpack.i.l.bf16 %v2765_v22 }
 0x561   : > { %v2770_v43 = vpop.permute.xlu0 %2769 }
 0x562   : > { %v2772_v17 = vunpack.i.h.bf16 %v2770_v43  ;;  %v2771_v12 = vunpack.i.l.bf16 %v2770_v43 }
 0x563   : > { %v2760_v35 = vpop.permute.xlu1 %2759 }
 0x564   : > { %v2762_v26 = vunpack.i.h.bf16 %v2760_v35  ;;  %v2761_v28 = vunpack.i.l.bf16 %v2760_v35 }
 0x566   : > { %v2035_v63 = vsel %vm1368_vm9, %v1950_v0, %v2761_v28  ;;  %v2036_v16 = vsel %vm1368_vm9, %v2004_v2, %v2762_v26 }
 0x567   : > { %v2038_v30 = vsel %vm2037_vm11, %v2035_v63, %v2766_v53  ;;  %v2039_v32 = vsel %vm2037_vm11, %v2036_v16, %v2767_v25  ;;  %v2652_v25 = vld [vmem:[%s3065_s22 + $0x20] sm:$0xff] }
 0x568   : > { %v2041_v33 = vsel %vm2040_vm12, %v2038_v30, %v2771_v12  ;;  %v2042_v34 = vsel %vm2040_vm12, %v2039_v32, %v2772_v17  ;;  %2313 = vmatpush.bf16.msra.mxu1 %v2652_v25 }
 0x569   : > { %v2043_v36 = vpack.c.bf16 %v2042_v34, %v2041_v33  ;;  %v2651_v33 = vld [vmem:[%s3065_s22 + $0x18] sm:$0xff] }
 0x56b   : > { %2557 = vmatmul.msk.bf16.vlgmr.msrb.gmra.mxu3 %vm2061_vm13, %v2043_v36 }
 0x56c   : > { %2314 = vmatpush.bf16.msra.mxu1 %v2651_v33 }
 0x570   : > { %2315 = vmatpush.bf16.msra.mxu1 %v2650_v41 }
 0x5ee   : > { %v2074_v7 = vpop.f32.mrf.mxu3 }
 0x5ef   : > { %v2075_v47 = vadd.f32 %v2074_v7, %v2048_v42 }
 0x5f1   : > { %v3681_v40 = vadd.f32 %v2820_v11, %v2075_v47  ;;  %v2649_v11 = vld [vmem:[%s3065_s22 + $0x8] sm:$0xff] }
 0x5f2   : > { %2316 = vmatpush.bf16.msra.mxu1 %v2649_v11 }
 0x5f6   : > { %v2076_v23 = vpop.f32.mrf.mxu3 }
 0x5f7   : > { %v2077_v18 = vadd.f32 %v2076_v23, %v2048_v42 }
 0x5f9   : > { %v3683_v48 = vadd.f32 %v2821_v46, %v2077_v18 }
 0x5fb   : > { %v2081_v49 = vpack.c.bf16 %v3683_v48, %v3681_v40 }
 0x5fd   : > { %2158 = vmatmul.bf16.vlgmr.msra.gmra.mxu0 %v2081_v49 }
 0x67a   : > { %v2159_v51 = vpop.f32.mrf.mxu0 }
 0x67b   : > { %v3692_v21 = vadd.f32 %v2774_v50, %v2159_v51 }
 0x67d   : > { %v3695_v52 = vmul.f32 0.70710677, %v3692_v21 }
 0x67f   : > { %v2172_v55 = vand.u32 2147483647, %v3695_v52  ;;  %vm2168_vm6 = vcmp.ge.f32.partialorder %v3695_v52, 0.0 }
 0x681   : > { %v2174_v58 = vmul.f32 0.3275911, %v2172_v55  ;;  %v2226_v13 = vsub.f32 0.0, %v2172_v55 }
 0x682   : > { %v2161_v4 = vpop.f32.mrf.mxu0 }
 0x683   : > { %v2176_v60 = vadd.f32 1.0, %v2174_v58  ;;  %v3698_v45 = vadd.f32 %v2774_v50, %v2161_v4  ;;  %v2228_v26 = vmul.f32 %v2226_v13, %v2172_v55  ;;  %v2648_v55 = vld [vmem:[%s3065_s22] sm:$0xff]  ;;  %s2955_s22 = smov [#allocation5]  }
 0x684   : > { %2317 = vmatpush.bf16.msra.mxu1 %v2648_v55  ;;  %s2336_s14 = sshll.u32 %s2955_s22, 4  ;;  %s2337_s14 = int_to_ptr.vmem [resolvable:$true] %s2336_s14 }
 0x685   : > { %2811 = vrcp.f32 %v2176_v60  ;;  %v3701_v59 = vmul.f32 0.70710677, %v3698_v45  ;;  %v2189_v3 = vand.u32 2147483648, %v2176_v60  ;;  %v2187_v5 = vand.u32 2147483647, %v2176_v60 }
 0x686   : > { %vm2183_vm15 = vweird.f32 %v2176_v60  ;;  %v2230_v16 = vmul.f32 1.442695, %v2228_v26 }
 0x687   : > { %v2173_v61 = vand.u32 2147483647, %v3701_v59  ;;  %v2190_v62 = vor.u32 1.1754944e-38, %v2189_v3  ;;  %vm2188_vm1 = vcmp.eq.f32.partialorder %v2187_v5, 8.507059e+37  ;;  %vm2169_vm7 = vcmp.ge.f32.partialorder %v3701_v59, 0.0 }
 0x689   : > { %v2175_v24 = vmul.f32 0.3275911, %v2173_v61  ;;  %v2227_v32 = vsub.f32 0.0, %v2173_v61 }
 0x68b   : > { %v2812_v0 = vpop.eup %2811  ;;  %v2177_v15 = vadd.f32 1.0, %v2175_v24  ;;  %v2229_v38 = vmul.f32 %v2227_v32, %v2173_v61 }
 0x68c   : > { %v2179_v29 = vmul.f32 %v2812_v0, %v2176_v60  ;;  %vm2184_vm14 = vweird.f32 %v2812_v0 }
 0x68d   : > { %2813 = vrcp.f32 %v2177_v15  ;;  %vm2185_vm0 = vmor %vm2183_vm15, %vm2184_vm14  ;;  %v2204_v54 = vand.u32 2147483648, %v2177_v15  ;;  %v2202_v43 = vand.u32 2147483647, %v2177_v15  ;;  %vm2198_vm3 = vweird.f32 %v2177_v15 }
 0x68e   : > { %v2180_v1 = vsub.f32 1.0, %v2179_v29  ;;  %2815 = vpow2.f32 %v2230_v16  ;;  %v2232_v18 = vmul.f32 1.442695, %v2229_v38 }
 0x68f   : > { %v2205_v17 = vor.u32 1.1754944e-38, %v2204_v54  ;;  %vm2203_vm5 = vcmp.eq.f32.partialorder %v2202_v43, 8.507059e+37 }
 0x690   : > { %v2181_v56 = vmul.f32 %v2812_v0, %v2180_v1  ;;  %2817 = vpow2.f32 %v2232_v18 }
 0x692   : > { %v2182_v9 = vadd.f32 %v2812_v0, %v2181_v56 }
 0x693   : > { %v2814_v19 = vpop.eup %2813 }
 0x694   : > { %v2186_v57 = vsel %vm2185_vm0, %v2812_v0, %v2182_v9  ;;  %v2194_v2 = vmul.f32 %v2814_v19, %v2177_v15  ;;  %vm2199_vm2 = vweird.f32 %v2814_v19  ;;  %v2816_v49 = vpop.eup %2815  ;;  %v2954_v0 = vmov -1.0  }
 0x695   : > { %v2191_v39 = vsel %vm2188_vm1, %v2190_v62, %v2186_v57  ;;  %vm2200_vm4 = vmor %vm2198_vm3, %vm2199_vm2  ;;  %v2170_v29 = vsel %vm2168_vm6, 1.0, %v2954_v0  ;;  %v2171_v56 = vsel %vm2169_vm7, 1.0, %v2954_v0  ;;  %v2164_v9 = vmul.f32 0.5, %v3692_v21 }
 0x696   : > { %v2208_v8 = vmul.f32 1.0614054, %v2191_v39  ;;  %v2195_v14 = vsub.f32 1.0, %v2194_v2  ;;  %v2818_v24 = vpop.eup %2817  ;;  %v2165_v62 = vmul.f32 0.5, %v3698_v45 }
 0x698   : > { %v2210_v20 = vadd.f32 -1.4531521, %v2208_v8  ;;  %v2196_v22 = vmul.f32 %v2814_v19, %v2195_v14 }
 0x69a   : > { %v2212_v35 = vmul.f32 %v2210_v20, %v2191_v39  ;;  %v2197_v28 = vadd.f32 %v2814_v19, %v2196_v22 }
 0x69c   : > { %v2214_v53 = vadd.f32 1.4214138, %v2212_v35  ;;  %v2201_v12 = vsel %vm2200_vm4, %v2814_v19, %v2197_v28 }
 0x69d   : > { %v2206_v30 = vsel %vm2203_vm5, %v2205_v17, %v2201_v12 }
 0x69e   : > { %v2216_v63 = vmul.f32 %v2214_v53, %v2191_v39  ;;  %v2209_v34 = vmul.f32 1.0614054, %v2206_v30 }
 0x6a0   : > { %v2218_v36 = vadd.f32 -0.28449672, %v2216_v63  ;;  %v2211_v37 = vadd.f32 -1.4531521, %v2209_v34 }
 0x6a2   : > { %v2220_v10 = vmul.f32 %v2218_v36, %v2191_v39  ;;  %v2213_v7 = vmul.f32 %v2211_v37, %v2206_v30 }
 0x6a4   : > { %v2222_v42 = vadd.f32 0.2548296, %v2220_v10  ;;  %v2215_v47 = vadd.f32 1.4214138, %v2213_v7 }
 0x6a6   : > { %v2224_v23 = vmul.f32 %v2222_v42, %v2191_v39  ;;  %v2217_v46 = vmul.f32 %v2215_v47, %v2206_v30  ;;  %v2261_v39 = vperm.slane %v3678_v31, 3 }
 0x6a8   : > { %v2234_v50 = vmul.f32 %v2816_v49, %v2224_v23  ;;  %v2219_v51 = vadd.f32 -0.28449672, %v2217_v46 }
 0x6aa   : > { %v2221_v58 = vmul.f32 %v2219_v51, %v2206_v30  ;;  %v2236_v4 = vsub.f32 1.0, %v2234_v50 }
 0x6ac   : > { %v2223_v60 = vadd.f32 0.2548296, %v2221_v58  ;;  %v2238_v15 = vmul.f32 %v2236_v4, %v2170_v29 }
 0x6ae   : > { %v2225_v61 = vmul.f32 %v2223_v60, %v2206_v30  ;;  %v2240_v5 = vadd.f32 1.0, %v2238_v15 }
 0x6b0   : > { %v2235_v1 = vmul.f32 %v2818_v24, %v2225_v61  ;;  %v2242_v19 = vmul.f32 %v2240_v5, %v2164_v9 }
 0x6b2   : > { %v2237_v3 = vsub.f32 1.0, %v2235_v1 }
 0x6b4   : > { %v2239_v6 = vmul.f32 %v2237_v3, %v2171_v56 }
 0x6b6   : > { %v2241_v52 = vadd.f32 1.0, %v2239_v6 }
 0x6b8   : > { %v2243_v57 = vmul.f32 %v2241_v52, %v2165_v62 }
 0x6ba   : > { %v2244_v27 = vpack.c.bf16 %v2243_v57, %v2242_v19 }
 0x6bc   : > { %2318 = vmatmul.bf16.vlgmr.msra.gmra.mxu1 %v2244_v27 }
 0x739   : > { %v2319_v2 = vpop.f32.mrf.mxu1 }
 0x73a   : > { %v2320_v8 = vadd.f32 %v2319_v2, %v2261_v39 }
 0x73c   : > { %v2324_v59 = vadd.f32 %v2320_v8, %v3681_v40 }
 0x73e   : > { %2326 = vst [vmem:[#allocation5] sm:$0xff] %v2324_v59 }
 0x741   : > { %v2321_v13 = vpop.f32.mrf.mxu1 }
 0x742   : > { %v2322_v21 = vadd.f32 %v2321_v13, %v2261_v39 }
 0x744   : > { %v2325_v45 = vadd.f32 %v2322_v21, %v3683_v48 }
 0x746   : > { %2327 = vst [vmem:[#allocation5 + $0x8] sm:$0xff] %v2325_v45 }
 0x747   : > { %2659 = dma.vmem_to_hbm [thread:$0]  (%p2667_p1), %s2337_s14, 256, %s2339_s17, [#allocation4], %s2956_s26, %s2956_s26, %s2953_s9  }
 0x748   : > { %2909 = dma.done.wait (%p2667_p1), [#allocation4], 256  }
 0x749   : > { %2911 = vsyncadd (%p2667_p1), [#allocation4], 4294967040 }
 0x74a PF: > { %s22_s10 = sadd.s32 1, %s2934_s10   ;;  %s3765_s13 = sld [smem:[#allocation10_spill]] }
 0x74b   : > { %p19_p2 = scmp.ge.s32.totalorder %s22_s10, 4   ;;  %s3766_s30 = sld [smem:[#allocation8_spill]] }
 0x74c   : > { %s3767_s9 = sld [smem:[#allocation9_spill]]  ;;  %s3768_s27 = smov %s2918_s28 }
 0x74d   : > { %s3769_s28 = smov %s2922_s29  ;;  %21 = sbr.rel (!%p19_p2) target bundleno = 7 (0x7), region = 115 }
 0x750   : > { %s3770_s29 = smov %s3765_s13 }
 0x752   :  { %2355 = vsyncpa [#allocation3], 1 }
 0x753   :  { %2357 = vsyncpa [#allocation3 + $0x1], 1 }
 0x754   :  { %2358 = vsyncpa [#allocation4], 1 }
 0x755   :  { %2360 = vsyncpa [#allocation4 + $0x1], 1 }

</bundles_post_ra>
